<compile_context>
chip_gen: v5e
topology: v5e:2x2
jax: 0.10.0
libtpu: 0.0.40
codegen_flags: <defaults>
</compile_context>

<pallas_src>
import math
import functools

import jax
import jax.numpy as jnp
from jax import lax
from jax.experimental import pallas as pl
from jax.experimental.pallas import tpu as pltpu


def _round_up(v, m):
    return ((v + m - 1) // m) * m


def self_attention_kernel(x_ref, gamma_ref, beta_ref, m_ref,
                          wq_t_ref, wk_t_ref, wv_t_ref, wout_t_ref, bout_ref,
                          o_ref,
                          k_scr, v_scr, scale_scr, shift_scr,
                          *, n_head, eps, tq, inv_n):
    qi = pl.program_id(1)

    # ---------- per-batch prologue: GroupNorm stats + resident K / V --------
    @pl.when(qi == 0)
    def _prologue():
        x = x_ref[0].astype(jnp.float32)                       # (S, Cp) f32
        M = m_ref[...]                                         # (Cp, G) one-hot
        # Two-pass statistics (center first; avoids E[x^2]-mean^2 cancellation).
        s1 = jnp.sum(x, axis=0, keepdims=True)                                # (1, Cp)
        gmean = jnp.dot(s1, M, preferred_element_type=jnp.float32) * inv_n    # (1, G)
        mean_c = lax.dot_general(gmean, M, (((1,), (1,)), ((), ())),
                                 preferred_element_type=jnp.float32)          # (1, Cp)
        d = x - mean_c
        s2 = jnp.sum(d * d, axis=0, keepdims=True)                            # (1, Cp)
        gvar = jnp.dot(s2, M, preferred_element_type=jnp.float32) * inv_n     # (1, G)
        grstd = lax.rsqrt(gvar + eps)
        rstd_c = lax.dot_general(grstd, M, (((1,), (1,)), ((), ())),
                                 preferred_element_type=jnp.float32)          # (1, Cp)
        scale = rstd_c * gamma_ref[...]                        # (1, Cp)
        shift = beta_ref[...] - mean_c * scale                 # (1, Cp)
        scale_scr[...] = scale
        shift_scr[...] = shift
        normed = (x * scale + shift).astype(jnp.bfloat16)      # (S, Cp) bf16
        # Head-major K / V projections for the full sequence, resident across
        # the query tiles of this batch element.
        for h in range(n_head):
            k_scr[h] = jnp.dot(normed, wk_t_ref[h],
                               preferred_element_type=jnp.float32).astype(jnp.bfloat16)
            v_scr[h] = jnp.dot(normed, wv_t_ref[h],
                               preferred_element_type=jnp.float32).astype(jnp.bfloat16)

    # ---------- per query tile ----------------------------------------------
    row0 = pl.multiple_of(qi * tq, tq)
    x_tile = x_ref[:, pl.ds(row0, tq), :][0].astype(jnp.float32)   # (tq, Cp) f32
    normed_q = (x_tile * scale_scr[...] + shift_scr[...]).astype(jnp.bfloat16)

    trans_b = (((1,), (1,)), ((), ()))                         # contract last dims
    head_outs = []
    for h in range(n_head):
        # Wq already carries the 1/sqrt(C) softmax scale (folded host-side).
        q_h = jnp.dot(normed_q, wq_t_ref[h],
                      preferred_element_type=jnp.float32).astype(jnp.bfloat16)  # (tq, hdp)
        k_h = k_scr[h]                                         # (S, hdp) bf16 (Ref slice)
        v_h = v_scr[h]                                         # (S, hdp) bf16
        logits = lax.dot_general(q_h, k_h, trans_b,
                                 preferred_element_type=jnp.float32)            # (tq, S) f32
        logits = logits - jnp.max(logits, axis=-1, keepdims=True)
        p = jnp.exp(logits)                                                     # unnormalized
        denom = jnp.sum(p, axis=-1, keepdims=True)                              # (tq, 1)
        head_out = jnp.dot(p.astype(jnp.bfloat16), v_h,
                           preferred_element_type=jnp.float32)                  # (tq, hdp)
        # Normalize AFTER p@v: one (tq, hdp) scale instead of a (tq, S) one.
        head_out = head_out * pl.reciprocal(denom, approx=True)
        head_outs.append(head_out.astype(jnp.bfloat16))

    ho = head_outs[0] if n_head == 1 else jnp.concatenate(head_outs, axis=-1)   # (tq, n_head*hdp)
    # Single full-contraction output projection (no per-head short matmuls).
    acc = jnp.dot(ho, wout_t_ref[...], preferred_element_type=jnp.float32)      # (tq, Cp)
    o_ref[0] = (acc + bout_ref[...] + x_tile).astype(o_ref.dtype)


# ------------------------------ VMEM planning ---------------------------------

def _vmem_capacity_bytes():
    try:
        cap = int(pltpu.get_tpu_info().vmem_capacity_bytes)
        if cap >= 16 * 1024 * 1024:
            return cap
    except Exception:
        pass
    return 64 * 1024 * 1024   # conservative: v7x per-TensorCore VMEM


def _vmem_bytes(S, C_p, hd_p, n_head, G, tq, out_itemsize):
    """What the compiler actually allocates (double buffers, scratch, temps)."""
    Cq = n_head * hd_p
    b = 0
    b += 2 * S * C_p * 2                        # x block (bf16), double-buffered
    b += 2 * tq * C_p * out_itemsize            # output block, double-buffered
    b += 2 * 3 * C_p * 4                        # gamma / beta / bout (f32) x2
    b += 2 * C_p * G * 4                        # group one-hot x2
    b += 2 * 3 * n_head * C_p * hd_p * 2        # Wq/Wk/Wv slabs (bf16) x2
    b += 2 * Cq * C_p * 2                       # Wout slab (bf16) x2
    b += 2 * n_head * S * hd_p * 2              # K / V scratch (single copy)
    b += 2 * 2 * C_p * 4                        # scale / shift scratch
    b += S * C_p * (4 + 2)                      # prologue: x f32 upcast + normed bf16
    b += tq * S * (4 + 4 + 2)                   # logits f32 + exp f32 + p bf16
    b += tq * (Cq * 2 + 2 * C_p * 4)            # head concat bf16 + acc/x_tile f32
    return b


def _pick_tq(S, C_p, hd_p, n_head, G, out_itemsize, cap):
    budget = int(cap * 0.8)
    cands = [c for c in (512, 256, 128, 64, 32, 16, 8) if S % c == 0]
    if not cands:
        return S                                 # single full-S tile
    for c in cands:
        if _vmem_bytes(S, C_p, hd_p, n_head, G, c, out_itemsize) <= budget:
            return c
    return cands[-1]


# --------------------------------- wrapper -------------------------------------

def self_attention(x_nchw, params, *, n_head=1, norm_groups=32, eps=1e-5, tq=None):
    B, C, H, W = x_nchw.shape
    S = H * W
    assert C % n_head == 0 and C % norm_groups == 0
    hd = C // n_head
    cg = C // norm_groups
    G = norm_groups

    # Lane padding: channel dim and per-head dim padded to multiples of 128 so
    # every vreg / MXU pass and the output stores are lane-dense.
    C_p = _round_up(C, 128)
    hd_p = _round_up(hd, 128)
    Cq = n_head * hd_p

    out_dtype = x_nchw.dtype
    out_itemsize = jnp.dtype(out_dtype).itemsize
    cap = _vmem_capacity_bytes()
    if tq is None:
        tq = _pick_tq(S, C_p, hd_p, n_head, G, out_itemsize, cap)
    assert S % tq == 0 and (tq % 8 == 0 or tq == S)

    # NCHW -> (B, S, C) channels-last, zero-pad channels, cast to bf16.
    # TODO(synk): keep the surrounding model channels-last to avoid this
    # HBM round trip.
    x = jnp.transpose(x_nchw, (0, 2, 3, 1)).reshape(B, S, C)
    if C_p != C:
        x = jnp.pad(x, ((0, 0), (0, 0), (0, C_p - C)))
    x = x.astype(jnp.bfloat16)

    gamma = jnp.zeros((1, C_p), jnp.float32).at[0, :C].set(
        params["gamma"].astype(jnp.float32))
    beta = jnp.zeros((1, C_p), jnp.float32).at[0, :C].set(
        params["beta"].astype(jnp.float32))
    bout = jnp.zeros((1, C_p), jnp.float32).at[0, :C].set(
        params["b_out"].astype(jnp.float32))

    # GroupNorm group-membership one-hot (padded channels belong to no group).
    M = jnp.zeros((C_p, G), jnp.float32)
    M = M.at[:C, :].set((jnp.arange(C)[:, None] // cg ==
                         jnp.arange(G)[None, :]).astype(jnp.float32))

    # PyTorch qkv 1x1-conv weight is (3C, C) with per-head [q|k|v] output
    # channel layout; split into head-major padded slabs (Cin_p, hd_p) and fold
    # the 1/sqrt(C) softmax scale into Wq (all free, host-side).
    w_qkv = params["w_qkv"].astype(jnp.float32).reshape(n_head, 3, hd, C)

    def head_major_t(w):            # (n_head, hd, C) -> (n_head, C_p, hd_p) bf16
        out = jnp.zeros((n_head, C_p, hd_p), jnp.float32)
        out = out.at[:, :C, :hd].set(jnp.transpose(w, (0, 2, 1)))
        return out.astype(jnp.bfloat16)

    wq_t = head_major_t(w_qkv[:, 0] / math.sqrt(C))
    wk_t = head_major_t(w_qkv[:, 1])
    wv_t = head_major_t(w_qkv[:, 2])

    # Output 1x1 conv weight (Cout=C, Cin=C head-major) -> padded (Cq, C_p)^T.
    w_out = params["w_out"].astype(jnp.float32)
    wout_t = jnp.zeros((Cq, C_p), jnp.float32)
    for h in range(n_head):
        blk = w_out[:, h * hd:(h + 1) * hd].T              # (hd, C)
        wout_t = wout_t.at[h * hd_p:h * hd_p + hd, :C].set(blk)
    wout_t = wout_t.astype(jnp.bfloat16)

    est = _vmem_bytes(S, C_p, hd_p, n_head, G, tq, out_itemsize)
    vmem_limit = min(max(int(est * 1.5), 32 * 1024 * 1024), int(cap * 0.9))

    kernel = functools.partial(self_attention_kernel, n_head=n_head, eps=eps,
                               tq=tq, inv_n=1.0 / float(S * cg))

    out = pl.pallas_call(
        kernel,
        out_shape=jax.ShapeDtypeStruct((B, S, C_p), out_dtype),
        grid=(B, S // tq),
        in_specs=[
            pl.BlockSpec((1, S, C_p), lambda b, qi: (b, 0, 0)),       # x (resident per batch)
            pl.BlockSpec((1, C_p), lambda b, qi: (0, 0)),             # gamma
            pl.BlockSpec((1, C_p), lambda b, qi: (0, 0)),             # beta
            pl.BlockSpec((C_p, G), lambda b, qi: (0, 0)),             # group one-hot
            pl.BlockSpec((n_head, C_p, hd_p), lambda b, qi: (0, 0, 0)),   # Wq^T (scaled)
            pl.BlockSpec((n_head, C_p, hd_p), lambda b, qi: (0, 0, 0)),   # Wk^T
            pl.BlockSpec((n_head, C_p, hd_p), lambda b, qi: (0, 0, 0)),   # Wv^T
            pl.BlockSpec((Cq, C_p), lambda b, qi: (0, 0)),            # Wout^T
            pl.BlockSpec((1, C_p), lambda b, qi: (0, 0)),             # out bias
        ],
        out_specs=pl.BlockSpec((1, tq, C_p), lambda b, qi: (b, qi, 0)),
        scratch_shapes=[
            pltpu.VMEM((n_head, S, hd_p), jnp.bfloat16),   # K slab, head-major
            pltpu.VMEM((n_head, S, hd_p), jnp.bfloat16),   # V slab, head-major
            pltpu.VMEM((1, C_p), jnp.float32),             # GroupNorm scale
            pltpu.VMEM((1, C_p), jnp.float32),             # GroupNorm shift
        ],
        compiler_params=pltpu.CompilerParams(
            dimension_semantics=("parallel", "arbitrary"),
            vmem_limit_bytes=vmem_limit),
    )(x, gamma, beta, M, wq_t, wk_t, wv_t, wout_t, bout)

    out = out[..., :C]
    return jnp.transpose(out.reshape(B, H, W, C), (0, 3, 1, 2))


def reference(x, params, *, n_head, norm_groups, eps=1e-5):
    """Pure-JAX f32 reference mirroring the PyTorch forward (NCHW)."""
    B, C, H, W = x.shape
    cg = C // norm_groups
    xr = x.reshape(B, norm_groups, cg, H, W)
    mean = xr.mean(axis=(2, 3, 4), keepdims=True)
    var = xr.var(axis=(2, 3, 4), keepdims=True)
    normed = (xr - mean) / jnp.sqrt(var + eps)
    normed = normed.reshape(B, C, H, W)
    normed = normed * params["gamma"].reshape(1, C, 1, 1) + params["beta"].reshape(1, C, 1, 1)
    qkv = jnp.einsum("oc,bchw->bohw", params["w_qkv"], normed)
    qkv = qkv.reshape(B, n_head, (C // n_head) * 3, H, W)
    q, k, v = jnp.split(qkv, 3, axis=2)
    attn = jnp.einsum("bnchw,bncyx->bnhwyx", q, k) / math.sqrt(C)
    attn = attn.reshape(B, n_head, H, W, H * W)
    attn = jax.nn.softmax(attn, axis=-1)
    attn = attn.reshape(B, n_head, H, W, H, W)
    out = jnp.einsum("bnhwyx,bncyx->bnchw", attn, v).reshape(B, C, H, W)
    out = jnp.einsum("oc,bchw->bohw", params["w_out"], out) + params["b_out"].reshape(1, C, 1, 1)
    return out + x


if __name__ == "__main__":
    B, C, H, W = 2, 32, 8, 8
    n_head, norm_groups = 2, 32     # head_dim = 16; norm_groups matches module default

    key = jax.random.PRNGKey(0)
    kx, kg, kb, kq, ko, kbo = jax.random.split(key, 6)
    x = jax.random.normal(kx, (B, C, H, W), jnp.float32)
    params = {
        "gamma": 1.0 + 0.1 * jax.random.normal(kg, (C,), jnp.float32),
        "beta": 0.1 * jax.random.normal(kb, (C,), jnp.float32),
        "w_qkv": jax.random.normal(kq, (3 * C, C), jnp.float32) / math.sqrt(C),
        "w_out": jax.random.normal(ko, (C, C), jnp.float32) / math.sqrt(C),
        "b_out": 0.1 * jax.random.normal(kbo, (C,), jnp.float32),
    }

    # tq=16 -> 4 query tiles per batch element, exercising the scratch-resident
    # head-major K/V path (S=64 would otherwise be a single tile).
    out = self_attention(x, params, n_head=n_head, norm_groups=norm_groups, tq=16)
    out = jax.block_until_ready(out)

    ref = reference(x, params, n_head=n_head, norm_groups=norm_groups)
    assert out.shape == x.shape
    # Tolerance accounts for bf16 activations + bf16 MXU operands (f32
    # accumulation, f32 GroupNorm / softmax stats) and the approx reciprocal.
    if not jnp.allclose(out, ref, atol=7e-2, rtol=2e-2):
        raise AssertionError("Pallas kernel does not match reference")
    print("KERNEL_OK")
</pallas_src>

<mosaic_0001>
module attributes {stable_mosaic.version = 11 : i64} {
  func.func @self_attention_kernel(%arg0: i32, %arg1: i32, %arg2: memref<1x64x128xbf16, #tpu.memory_space<vmem>>, %arg3: memref<1x128xf32, #tpu.memory_space<vmem>>, %arg4: memref<1x128xf32, #tpu.memory_space<vmem>>, %arg5: memref<128x32xf32, #tpu.memory_space<vmem>>, %arg6: memref<2x128x128xbf16, #tpu.memory_space<vmem>>, %arg7: memref<2x128x128xbf16, #tpu.memory_space<vmem>>, %arg8: memref<2x128x128xbf16, #tpu.memory_space<vmem>>, %arg9: memref<256x128xbf16, #tpu.memory_space<vmem>>, %arg10: memref<1x128xf32, #tpu.memory_space<vmem>>, %arg11: memref<1x16x128xf32, #tpu.memory_space<vmem>>, %arg12: memref<2x64x128xbf16, #tpu.memory_space<vmem>>, %arg13: memref<2x64x128xbf16, #tpu.memory_space<vmem>>, %arg14: memref<1x128xf32, #tpu.memory_space<vmem>>, %arg15: memref<1x128xf32, #tpu.memory_space<vmem>>) attributes {dimension_semantics = [#tpu.dimension_semantics<parallel>, #tpu.dimension_semantics<arbitrary>], iteration_bounds = array<i64: 2, 4>, scalar_prefetch = 0 : i64, scratch_operands = 4 : i64, tpu.core_type = #tpu.core_type<tc>, window_params = [{transform_indices = @transform_0, window_bounds = array<i64: 1, 64, 128>}, {pipeline_mode = #tpu.pipeline_mode<synchronous>, transform_indices = @transform_1, window_bounds = array<i64: 1, 128>}, {pipeline_mode = #tpu.pipeline_mode<synchronous>, transform_indices = @transform_2, window_bounds = array<i64: 1, 128>}, {pipeline_mode = #tpu.pipeline_mode<synchronous>, transform_indices = @transform_3, window_bounds = array<i64: 128, 32>}, {pipeline_mode = #tpu.pipeline_mode<synchronous>, transform_indices = @transform_4, window_bounds = array<i64: 2, 128, 128>}, {pipeline_mode = #tpu.pipeline_mode<synchronous>, transform_indices = @transform_5, window_bounds = array<i64: 2, 128, 128>}, {pipeline_mode = #tpu.pipeline_mode<synchronous>, transform_indices = @transform_6, window_bounds = array<i64: 2, 128, 128>}, {pipeline_mode = #tpu.pipeline_mode<synchronous>, transform_indices = @transform_7, window_bounds = array<i64: 256, 128>}, {pipeline_mode = #tpu.pipeline_mode<synchronous>, transform_indices = @transform_8, window_bounds = array<i64: 1, 128>}, {transform_indices = @transform_9, window_bounds = array<i64: 1, 16, 128>}]} {
    %c0_i32 = arith.constant 0 : i32
    %0 = arith.cmpi eq, %arg1, %c0_i32 : i32
    %1 = arith.extui %0 : i1 to i32
    %c0_i32_0 = arith.constant 0 : i32
    %2 = arith.cmpi ne, %1, %c0_i32_0 : i32
    scf.if %2 {
      %c0_40 = arith.constant 0 : index
      %c0_41 = arith.constant 0 : index
      %c0_42 = arith.constant 0 : index
      %70 = vector.load %arg2[%c0_40, %c0_41, %c0_42] : memref<1x64x128xbf16, #tpu.memory_space<vmem>>, vector<1x64x128xbf16>
      %71 = vector.shape_cast %70 : vector<1x64x128xbf16> to vector<64x128xbf16>
      %72 = arith.extf %71 : vector<64x128xbf16> to vector<64x128xf32>
      %c0_43 = arith.constant 0 : index
      %c0_44 = arith.constant 0 : index
      %73 = vector.load %arg5[%c0_43, %c0_44] : memref<128x32xf32, #tpu.memory_space<vmem>>, vector<128x32xf32>
      %cst_45 = arith.constant dense<0.000000e+00> : vector<128xf32>
      %74 = vector.multi_reduction <add>, %72, %cst_45 [0] : vector<64x128xf32> to vector<128xf32>
      %75 = vector.shape_cast %74 : vector<128xf32> to vector<1x128xf32>
      %cst_46 = arith.constant dense<0.000000e+00> : vector<1x32xf32>
      %76 = tpu.matmul %75, %73, %cst_46 {dimension_numbers = #tpu.dot_dimension_numbers<[1], [0], [0], [1], [0, 0, 1, 1], [], []>} : vector<1x128xf32>, vector<128x32xf32>, vector<1x32xf32> -> vector<1x32xf32>
      %cst_47 = arith.constant 1.562500e-02 : f32
      %77 = vector.broadcast %cst_47 : f32 to vector<1x32xf32>
      %78 = arith.mulf %76, %77 : vector<1x32xf32>
      %cst_48 = arith.constant dense<0.000000e+00> : vector<1x128xf32>
      %79 = tpu.matmul %78, %73, %cst_48 {dimension_numbers = #tpu.dot_dimension_numbers<[1], [1], [0], [0], [0, 0, 1, 0], [], []>} : vector<1x32xf32>, vector<128x32xf32>, vector<1x128xf32> -> vector<1x128xf32>
      %80 = vector.broadcast %79 : vector<1x128xf32> to vector<64x128xf32>
      %81 = arith.subf %72, %80 : vector<64x128xf32>
      %82 = arith.mulf %81, %81 : vector<64x128xf32>
      %cst_49 = arith.constant dense<0.000000e+00> : vector<128xf32>
      %83 = vector.multi_reduction <add>, %82, %cst_49 [0] : vector<64x128xf32> to vector<128xf32>
      %84 = vector.shape_cast %83 : vector<128xf32> to vector<1x128xf32>
      %cst_50 = arith.constant dense<0.000000e+00> : vector<1x32xf32>
      %85 = tpu.matmul %84, %73, %cst_50 {dimension_numbers = #tpu.dot_dimension_numbers<[1], [0], [0], [1], [0, 0, 1, 1], [], []>} : vector<1x128xf32>, vector<128x32xf32>, vector<1x32xf32> -> vector<1x32xf32>
      %cst_51 = arith.constant 1.562500e-02 : f32
      %86 = vector.broadcast %cst_51 : f32 to vector<1x32xf32>
      %87 = arith.mulf %85, %86 : vector<1x32xf32>
      %cst_52 = arith.constant 9.99999974E-6 : f32
      %88 = vector.broadcast %cst_52 : f32 to vector<1x32xf32>
      %89 = arith.addf %87, %88 : vector<1x32xf32>
      %90 = math.rsqrt %89 : vector<1x32xf32>
      %cst_53 = arith.constant dense<0.000000e+00> : vector<1x128xf32>
      %91 = tpu.matmul %90, %73, %cst_53 {dimension_numbers = #tpu.dot_dimension_numbers<[1], [1], [0], [0], [0, 0, 1, 0], [], []>} : vector<1x32xf32>, vector<128x32xf32>, vector<1x128xf32> -> vector<1x128xf32>
      %c0_54 = arith.constant 0 : index
      %c0_55 = arith.constant 0 : index
      %92 = vector.load %arg3[%c0_54, %c0_55] : memref<1x128xf32, #tpu.memory_space<vmem>>, vector<1x128xf32>
      %93 = arith.mulf %91, %92 : vector<1x128xf32>
      %c0_56 = arith.constant 0 : index
      %c0_57 = arith.constant 0 : index
      %94 = vector.load %arg4[%c0_56, %c0_57] : memref<1x128xf32, #tpu.memory_space<vmem>>, vector<1x128xf32>
      %95 = arith.mulf %79, %93 : vector<1x128xf32>
      %96 = arith.subf %94, %95 : vector<1x128xf32>
      %c0_58 = arith.constant 0 : index
      %c0_59 = arith.constant 0 : index
      %97 = vector.load %arg14[%c0_58, %c0_59] : memref<1x128xf32, #tpu.memory_space<vmem>>, vector<1x128xf32>
      tpu.vector_store %arg14[%c0_58, %c0_59], %93 {strides = array<i32>} : memref<1x128xf32, #tpu.memory_space<vmem>>, vector<1x128xf32>,
      %c0_60 = arith.constant 0 : index
      %c0_61 = arith.constant 0 : index
      %98 = vector.load %arg15[%c0_60, %c0_61] : memref<1x128xf32, #tpu.memory_space<vmem>>, vector<1x128xf32>
      tpu.vector_store %arg15[%c0_60, %c0_61], %96 {strides = array<i32>} : memref<1x128xf32, #tpu.memory_space<vmem>>, vector<1x128xf32>,
      %99 = vector.broadcast %93 : vector<1x128xf32> to vector<64x128xf32>
      %100 = arith.mulf %72, %99 : vector<64x128xf32>
      %101 = vector.broadcast %96 : vector<1x128xf32> to vector<64x128xf32>
      %102 = arith.addf %100, %101 : vector<64x128xf32>
      %103 = arith.truncf %102 : vector<64x128xf32> to vector<64x128xbf16>
      %c0_62 = arith.constant 0 : index
      %c0_63 = arith.constant 0 : index
      %c0_64 = arith.constant 0 : index
      %104 = vector.load %arg7[%c0_62, %c0_63, %c0_64] : memref<2x128x128xbf16, #tpu.memory_space<vmem>>, vector<1x128x128xbf16>
      %105 = vector.shape_cast %104 : vector<1x128x128xbf16> to vector<128x128xbf16>
      %cst_65 = arith.constant dense<0.000000e+00> : vector<64x128xf32>
      %106 = tpu.matmul %103, %105, %cst_65 {dimension_numbers = #tpu.dot_dimension_numbers<[1], [0], [0], [1], [0, 0, 1, 1], [], []>} : vector<64x128xbf16>, vector<128x128xbf16>, vector<64x128xf32> -> vector<64x128xf32>
      %107 = arith.truncf %106 : vector<64x128xf32> to vector<64x128xbf16>
      %c0_66 = arith.constant 0 : index
      %c0_67 = arith.constant 0 : index
      %c0_68 = arith.constant 0 : index
      %108 = vector.load %arg12[%c0_66, %c0_67, %c0_68] : memref<2x64x128xbf16, #tpu.memory_space<vmem>>, vector<1x64x128xbf16>
      %109 = vector.shape_cast %108 : vector<1x64x128xbf16> to vector<64x128xbf16>
      %110 = vector.shape_cast %107 : vector<64x128xbf16> to vector<1x64x128xbf16>
      tpu.vector_store %arg12[%c0_66, %c0_67, %c0_68], %110 {strides = array<i32>} : memref<2x64x128xbf16, #tpu.memory_space<vmem>>, vector<1x64x128xbf16>,
      %c0_69 = arith.constant 0 : index
      %c0_70 = arith.constant 0 : index
      %c0_71 = arith.constant 0 : index
      %111 = vector.load %arg8[%c0_69, %c0_70, %c0_71] : memref<2x128x128xbf16, #tpu.memory_space<vmem>>, vector<1x128x128xbf16>
      %112 = vector.shape_cast %111 : vector<1x128x128xbf16> to vector<128x128xbf16>
      %cst_72 = arith.constant dense<0.000000e+00> : vector<64x128xf32>
      %113 = tpu.matmul %103, %112, %cst_72 {dimension_numbers = #tpu.dot_dimension_numbers<[1], [0], [0], [1], [0, 0, 1, 1], [], []>} : vector<64x128xbf16>, vector<128x128xbf16>, vector<64x128xf32> -> vector<64x128xf32>
      %114 = arith.truncf %113 : vector<64x128xf32> to vector<64x128xbf16>
      %c0_73 = arith.constant 0 : index
      %c0_74 = arith.constant 0 : index
      %c0_75 = arith.constant 0 : index
      %115 = vector.load %arg13[%c0_73, %c0_74, %c0_75] : memref<2x64x128xbf16, #tpu.memory_space<vmem>>, vector<1x64x128xbf16>
      %116 = vector.shape_cast %115 : vector<1x64x128xbf16> to vector<64x128xbf16>
      %117 = vector.shape_cast %114 : vector<64x128xbf16> to vector<1x64x128xbf16>
      tpu.vector_store %arg13[%c0_73, %c0_74, %c0_75], %117 {strides = array<i32>} : memref<2x64x128xbf16, #tpu.memory_space<vmem>>, vector<1x64x128xbf16>,
      %c1_76 = arith.constant 1 : index
      %c0_77 = arith.constant 0 : index
      %c0_78 = arith.constant 0 : index
      %118 = vector.load %arg7[%c1_76, %c0_77, %c0_78] : memref<2x128x128xbf16, #tpu.memory_space<vmem>>, vector<1x128x128xbf16>
      %119 = vector.shape_cast %118 : vector<1x128x128xbf16> to vector<128x128xbf16>
      %cst_79 = arith.constant dense<0.000000e+00> : vector<64x128xf32>
      %120 = tpu.matmul %103, %119, %cst_79 {dimension_numbers = #tpu.dot_dimension_numbers<[1], [0], [0], [1], [0, 0, 1, 1], [], []>} : vector<64x128xbf16>, vector<128x128xbf16>, vector<64x128xf32> -> vector<64x128xf32>
      %121 = arith.truncf %120 : vector<64x128xf32> to vector<64x128xbf16>
      %c1_80 = arith.constant 1 : index
      %c0_81 = arith.constant 0 : index
      %c0_82 = arith.constant 0 : index
      %122 = vector.load %arg12[%c1_80, %c0_81, %c0_82] : memref<2x64x128xbf16, #tpu.memory_space<vmem>>, vector<1x64x128xbf16>
      %123 = vector.shape_cast %122 : vector<1x64x128xbf16> to vector<64x128xbf16>
      %124 = vector.shape_cast %121 : vector<64x128xbf16> to vector<1x64x128xbf16>
      tpu.vector_store %arg12[%c1_80, %c0_81, %c0_82], %124 {strides = array<i32>} : memref<2x64x128xbf16, #tpu.memory_space<vmem>>, vector<1x64x128xbf16>,
      %c1_83 = arith.constant 1 : index
      %c0_84 = arith.constant 0 : index
      %c0_85 = arith.constant 0 : index
      %125 = vector.load %arg8[%c1_83, %c0_84, %c0_85] : memref<2x128x128xbf16, #tpu.memory_space<vmem>>, vector<1x128x128xbf16>
      %126 = vector.shape_cast %125 : vector<1x128x128xbf16> to vector<128x128xbf16>
      %cst_86 = arith.constant dense<0.000000e+00> : vector<64x128xf32>
      %127 = tpu.matmul %103, %126, %cst_86 {dimension_numbers = #tpu.dot_dimension_numbers<[1], [0], [0], [1], [0, 0, 1, 1], [], []>} : vector<64x128xbf16>, vector<128x128xbf16>, vector<64x128xf32> -> vector<64x128xf32>
      %128 = arith.truncf %127 : vector<64x128xf32> to vector<64x128xbf16>
      %c1_87 = arith.constant 1 : index
      %c0_88 = arith.constant 0 : index
      %c0_89 = arith.constant 0 : index
      %129 = vector.load %arg13[%c1_87, %c0_88, %c0_89] : memref<2x64x128xbf16, #tpu.memory_space<vmem>>, vector<1x64x128xbf16>
      %130 = vector.shape_cast %129 : vector<1x64x128xbf16> to vector<64x128xbf16>
      %131 = vector.shape_cast %128 : vector<64x128xbf16> to vector<1x64x128xbf16>
      tpu.vector_store %arg13[%c1_87, %c0_88, %c0_89], %131 {strides = array<i32>} : memref<2x64x128xbf16, #tpu.memory_space<vmem>>, vector<1x64x128xbf16>,
    } else {
    }
    %c16_i32 = arith.constant 16 : i32
    %3 = arith.muli %arg1, %c16_i32 : i32
    %4 = tpu.assume_multiple %3, 16 : i32
    %c0 = arith.constant 0 : index
    %5 = arith.index_cast %4 : i32 to index
    %c0_1 = arith.constant 0 : index
    %6 = vector.load %arg2[%c0, %5, %c0_1] : memref<1x64x128xbf16, #tpu.memory_space<vmem>>, vector<1x16x128xbf16>
    %7 = vector.shape_cast %6 : vector<1x16x128xbf16> to vector<16x128xbf16>
    %8 = arith.extf %7 : vector<16x128xbf16> to vector<16x128xf32>
    %c0_2 = arith.constant 0 : index
    %c0_3 = arith.constant 0 : index
    %9 = vector.load %arg14[%c0_2, %c0_3] : memref<1x128xf32, #tpu.memory_space<vmem>>, vector<1x128xf32>
    %10 = vector.broadcast %9 : vector<1x128xf32> to vector<16x128xf32>
    %11 = arith.mulf %8, %10 : vector<16x128xf32>
    %c0_4 = arith.constant 0 : index
    %c0_5 = arith.constant 0 : index
    %12 = vector.load %arg15[%c0_4, %c0_5] : memref<1x128xf32, #tpu.memory_space<vmem>>, vector<1x128xf32>
    %13 = vector.broadcast %12 : vector<1x128xf32> to vector<16x128xf32>
    %14 = arith.addf %11, %13 : vector<16x128xf32>
    %15 = arith.truncf %14 : vector<16x128xf32> to vector<16x128xbf16>
    %c0_6 = arith.constant 0 : index
    %c0_7 = arith.constant 0 : index
    %c0_8 = arith.constant 0 : index
    %16 = vector.load %arg6[%c0_6, %c0_7, %c0_8] : memref<2x128x128xbf16, #tpu.memory_space<vmem>>, vector<1x128x128xbf16>
    %17 = vector.shape_cast %16 : vector<1x128x128xbf16> to vector<128x128xbf16>
    %cst = arith.constant dense<0.000000e+00> : vector<16x128xf32>
    %18 = tpu.matmul %15, %17, %cst {dimension_numbers = #tpu.dot_dimension_numbers<[1], [0], [0], [1], [0, 0, 1, 1], [], []>} : vector<16x128xbf16>, vector<128x128xbf16>, vector<16x128xf32> -> vector<16x128xf32>
    %19 = arith.truncf %18 : vector<16x128xf32> to vector<16x128xbf16>
    %c0_9 = arith.constant 0 : index
    %c0_10 = arith.constant 0 : index
    %c0_11 = arith.constant 0 : index
    %20 = vector.load %arg12[%c0_9, %c0_10, %c0_11] : memref<2x64x128xbf16, #tpu.memory_space<vmem>>, vector<1x64x128xbf16>
    %21 = vector.shape_cast %20 : vector<1x64x128xbf16> to vector<64x128xbf16>
    %c0_12 = arith.constant 0 : index
    %c0_13 = arith.constant 0 : index
    %c0_14 = arith.constant 0 : index
    %22 = vector.load %arg13[%c0_12, %c0_13, %c0_14] : memref<2x64x128xbf16, #tpu.memory_space<vmem>>, vector<1x64x128xbf16>
    %23 = vector.shape_cast %22 : vector<1x64x128xbf16> to vector<64x128xbf16>
    %cst_15 = arith.constant dense<0.000000e+00> : vector<16x64xf32>
    %24 = tpu.matmul %19, %21, %cst_15 {dimension_numbers = #tpu.dot_dimension_numbers<[1], [1], [0], [0], [0, 0, 1, 0], [], []>} : vector<16x128xbf16>, vector<64x128xbf16>, vector<16x64xf32> -> vector<16x64xf32>
    %cst_16 = arith.constant dense<0xFF800000> : vector<16xf32>
    %25 = vector.multi_reduction <maximumf>, %24, %cst_16 [1] : vector<16x64xf32> to vector<16xf32>
    %26 = vector.shape_cast %25 : vector<16xf32> to vector<16x1xf32>
    %27 = vector.broadcast %26 : vector<16x1xf32> to vector<16x64xf32>
    %28 = arith.subf %24, %27 : vector<16x64xf32>
    %29 = math.exp %28 : vector<16x64xf32>
    %cst_17 = arith.constant dense<0.000000e+00> : vector<16xf32>
    %30 = vector.multi_reduction <add>, %29, %cst_17 [1] : vector<16x64xf32> to vector<16xf32>
    %31 = vector.shape_cast %30 : vector<16xf32> to vector<16x1xf32>
    %32 = arith.truncf %29 : vector<16x64xf32> to vector<16x64xbf16>
    %cst_18 = arith.constant dense<0.000000e+00> : vector<16x128xf32>
    %33 = tpu.matmul %32, %23, %cst_18 {dimension_numbers = #tpu.dot_dimension_numbers<[1], [0], [0], [1], [0, 0, 1, 1], [], []>} : vector<16x64xbf16>, vector<64x128xbf16>, vector<16x128xf32> -> vector<16x128xf32>
    %34 = tpu.reciprocal %31 {approx = true} : vector<16x1xf32> -> vector<16x1xf32>
    %35 = vector.broadcast %34 : vector<16x1xf32> to vector<16x128xf32>
    %36 = arith.mulf %33, %35 : vector<16x128xf32>
    %37 = arith.truncf %36 : vector<16x128xf32> to vector<16x128xbf16>
    %c1 = arith.constant 1 : index
    %c0_19 = arith.constant 0 : index
    %c0_20 = arith.constant 0 : index
    %38 = vector.load %arg6[%c1, %c0_19, %c0_20] : memref<2x128x128xbf16, #tpu.memory_space<vmem>>, vector<1x128x128xbf16>
    %39 = vector.shape_cast %38 : vector<1x128x128xbf16> to vector<128x128xbf16>
    %cst_21 = arith.constant dense<0.000000e+00> : vector<16x128xf32>
    %40 = tpu.matmul %15, %39, %cst_21 {dimension_numbers = #tpu.dot_dimension_numbers<[1], [0], [0], [1], [0, 0, 1, 1], [], []>} : vector<16x128xbf16>, vector<128x128xbf16>, vector<16x128xf32> -> vector<16x128xf32>
    %41 = arith.truncf %40 : vector<16x128xf32> to vector<16x128xbf16>
    %c1_22 = arith.constant 1 : index
    %c0_23 = arith.constant 0 : index
    %c0_24 = arith.constant 0 : index
    %42 = vector.load %arg12[%c1_22, %c0_23, %c0_24] : memref<2x64x128xbf16, #tpu.memory_space<vmem>>, vector<1x64x128xbf16>
    %43 = vector.shape_cast %42 : vector<1x64x128xbf16> to vector<64x128xbf16>
    %c1_25 = arith.constant 1 : index
    %c0_26 = arith.constant 0 : index
    %c0_27 = arith.constant 0 : index
    %44 = vector.load %arg13[%c1_25, %c0_26, %c0_27] : memref<2x64x128xbf16, #tpu.memory_space<vmem>>, vector<1x64x128xbf16>
    %45 = vector.shape_cast %44 : vector<1x64x128xbf16> to vector<64x128xbf16>
    %cst_28 = arith.constant dense<0.000000e+00> : vector<16x64xf32>
    %46 = tpu.matmul %41, %43, %cst_28 {dimension_numbers = #tpu.dot_dimension_numbers<[1], [1], [0], [0], [0, 0, 1, 0], [], []>} : vector<16x128xbf16>, vector<64x128xbf16>, vector<16x64xf32> -> vector<16x64xf32>
    %cst_29 = arith.constant dense<0xFF800000> : vector<16xf32>
    %47 = vector.multi_reduction <maximumf>, %46, %cst_29 [1] : vector<16x64xf32> to vector<16xf32>
    %48 = vector.shape_cast %47 : vector<16xf32> to vector<16x1xf32>
    %49 = vector.broadcast %48 : vector<16x1xf32> to vector<16x64xf32>
    %50 = arith.subf %46, %49 : vector<16x64xf32>
    %51 = math.exp %50 : vector<16x64xf32>
    %cst_30 = arith.constant dense<0.000000e+00> : vector<16xf32>
    %52 = vector.multi_reduction <add>, %51, %cst_30 [1] : vector<16x64xf32> to vector<16xf32>
    %53 = vector.shape_cast %52 : vector<16xf32> to vector<16x1xf32>
    %54 = arith.truncf %51 : vector<16x64xf32> to vector<16x64xbf16>
    %cst_31 = arith.constant dense<0.000000e+00> : vector<16x128xf32>
    %55 = tpu.matmul %54, %45, %cst_31 {dimension_numbers = #tpu.dot_dimension_numbers<[1], [0], [0], [1], [0, 0, 1, 1], [], []>} : vector<16x64xbf16>, vector<64x128xbf16>, vector<16x128xf32> -> vector<16x128xf32>
    %56 = tpu.reciprocal %53 {approx = true} : vector<16x1xf32> -> vector<16x1xf32>
    %57 = vector.broadcast %56 : vector<16x1xf32> to vector<16x128xf32>
    %58 = arith.mulf %55, %57 : vector<16x128xf32>
    %59 = arith.truncf %58 : vector<16x128xf32> to vector<16x128xbf16>
    %60 = tpu.concatenate %37, %59 in 1 : vector<16x128xbf16>, vector<16x128xbf16> -> vector<16x256xbf16>
    %c0_32 = arith.constant 0 : index
    %c0_33 = arith.constant 0 : index
    %61 = vector.load %arg9[%c0_32, %c0_33] : memref<256x128xbf16, #tpu.memory_space<vmem>>, vector<256x128xbf16>
    %cst_34 = arith.constant dense<0.000000e+00> : vector<16x128xf32>
    %62 = tpu.matmul %60, %61, %cst_34 {dimension_numbers = #tpu.dot_dimension_numbers<[1], [0], [0], [1], [0, 0, 1, 1], [], []>} : vector<16x256xbf16>, vector<256x128xbf16>, vector<16x128xf32> -> vector<16x128xf32>
    %c0_35 = arith.constant 0 : index
    %c0_36 = arith.constant 0 : index
    %63 = vector.load %arg10[%c0_35, %c0_36] : memref<1x128xf32, #tpu.memory_space<vmem>>, vector<1x128xf32>
    %64 = vector.broadcast %63 : vector<1x128xf32> to vector<16x128xf32>
    %65 = arith.addf %62, %64 : vector<16x128xf32>
    %66 = arith.addf %65, %8 : vector<16x128xf32>
    %c0_37 = arith.constant 0 : index
    %c0_38 = arith.constant 0 : index
    %c0_39 = arith.constant 0 : index
    %67 = vector.load %arg11[%c0_37, %c0_38, %c0_39] : memref<1x16x128xf32, #tpu.memory_space<vmem>>, vector<1x16x128xf32>
    %68 = vector.shape_cast %67 : vector<1x16x128xf32> to vector<16x128xf32>
    %69 = vector.shape_cast %66 : vector<16x128xf32> to vector<1x16x128xf32>
    tpu.vector_store %arg11[%c0_37, %c0_38, %c0_39], %69 {strides = array<i32>} : memref<1x16x128xf32, #tpu.memory_space<vmem>>, vector<1x16x128xf32>,
    return
  }
  func.func @transform_0(%arg0: i32, %arg1: i32) -> (i32, i32, i32) {
    %c0_i32 = arith.constant 0 : i32
    %c0_i32_0 = arith.constant 0 : i32
    %c0_i32_1 = arith.constant 0 : i32
    return %arg0, %c0_i32, %c0_i32_0 : i32, i32, i32
  }
  func.func @transform_1(%arg0: i32, %arg1: i32) -> (i32, i32) {
    %c0_i32 = arith.constant 0 : i32
    %c0_i32_0 = arith.constant 0 : i32
    %c0_i32_1 = arith.constant 0 : i32
    return %c0_i32, %c0_i32_0 : i32, i32
  }
  func.func @transform_2(%arg0: i32, %arg1: i32) -> (i32, i32) {
    %c0_i32 = arith.constant 0 : i32
    %c0_i32_0 = arith.constant 0 : i32
    %c0_i32_1 = arith.constant 0 : i32
    return %c0_i32, %c0_i32_0 : i32, i32
  }
  func.func @transform_3(%arg0: i32, %arg1: i32) -> (i32, i32) {
    %c0_i32 = arith.constant 0 : i32
    %c0_i32_0 = arith.constant 0 : i32
    %c0_i32_1 = arith.constant 0 : i32
    return %c0_i32, %c0_i32_0 : i32, i32
  }
  func.func @transform_4(%arg0: i32, %arg1: i32) -> (i32, i32, i32) {
    %c0_i32 = arith.constant 0 : i32
    %c0_i32_0 = arith.constant 0 : i32
    %c0_i32_1 = arith.constant 0 : i32
    %c0_i32_2 = arith.constant 0 : i32
    return %c0_i32, %c0_i32_0, %c0_i32_1 : i32, i32, i32
  }
  func.func @transform_5(%arg0: i32, %arg1: i32) -> (i32, i32, i32) {
    %c0_i32 = arith.constant 0 : i32
    %c0_i32_0 = arith.constant 0 : i32
    %c0_i32_1 = arith.constant 0 : i32
    %c0_i32_2 = arith.constant 0 : i32
    return %c0_i32, %c0_i32_0, %c0_i32_1 : i32, i32, i32
  }
  func.func @transform_6(%arg0: i32, %arg1: i32) -> (i32, i32, i32) {
    %c0_i32 = arith.constant 0 : i32
    %c0_i32_0 = arith.constant 0 : i32
    %c0_i32_1 = arith.constant 0 : i32
    %c0_i32_2 = arith.constant 0 : i32
    return %c0_i32, %c0_i32_0, %c0_i32_1 : i32, i32, i32
  }
  func.func @transform_7(%arg0: i32, %arg1: i32) -> (i32, i32) {
    %c0_i32 = arith.constant 0 : i32
    %c0_i32_0 = arith.constant 0 : i32
    %c0_i32_1 = arith.constant 0 : i32
    return %c0_i32, %c0_i32_0 : i32, i32
  }
  func.func @transform_8(%arg0: i32, %arg1: i32) -> (i32, i32) {
    %c0_i32 = arith.constant 0 : i32
    %c0_i32_0 = arith.constant 0 : i32
    %c0_i32_1 = arith.constant 0 : i32
    return %c0_i32, %c0_i32_0 : i32, i32
  }
  func.func @transform_9(%arg0: i32, %arg1: i32) -> (i32, i32, i32) {
    %c0_i32 = arith.constant 0 : i32
    %c0_i32_0 = arith.constant 0 : i32
    return %arg0, %arg1, %c0_i32 : i32, i32, i32
  }
}

</mosaic_0001>

<bundles_post_ra>
// kernel: tpu_custom_call.1
= control target key start
LH: loop header
LB: loop body
LE: loop exit
PB: predicated region body
PF: predicated region fallthrough
CT: control target
= control target key end

     0   :  { %s3399_s0 = inlined_call_operand.hbm [shape: bf16[2,64,128], index: 0, kind: input, shape index: {}]   ;;  %s3400_s1 = inlined_call_operand.vmem [shape: f32[1,128], index: 1, kind: input, shape index: {}]   ;;  %s3401_s2 = inlined_call_operand.vmem [shape: f32[1,128], index: 2, kind: input, shape index: {}]   ;;  %s3402_s3 = inlined_call_operand.vmem [shape: f32[128,32], index: 3, kind: input, shape index: {}]   ;;  %s3403_s4 = inlined_call_operand.vmem [shape: bf16[2,128,128], index: 4, kind: input, shape index: {}]   ;;  %s3404_s5 = inlined_call_operand.hbm [shape: bf16[2,128,128], index: 5, kind: input, shape index: {}]   ;;  %s3405_s6 = inlined_call_operand.hbm [shape: bf16[2,128,128], index: 6, kind: input, shape index: {}]   ;;  %s3406_s7 = inlined_call_operand.hbm [shape: bf16[256,128], index: 7, kind: input, shape index: {}]   ;;  %s3407_s8 = inlined_call_operand.vmem [shape: f32[1,128], index: 8, kind: input, shape index: {}]   ;;  %s3408_s9 = inlined_call_operand.hbm [shape: f32[2,64,128], index: 9, kind: output, shape index: {}]  }
   0x1   :  { %3420 = sst [smem:[#allocation26_spill]] %s3401_s2 }
   0x2   :  { %3421 = sst [smem:[#allocation27_spill]] %s3403_s4 }
   0x3   :  { %3422 = sst [smem:[#allocation28_spill]] %s3404_s5 }
   0x4   :  { %3423 = sst [smem:[#allocation29_spill]] %s3405_s6 }
   0x5   :  { %3424 = sst [smem:[#allocation30_spill]] %s3406_s7 }
   0x6   :  { %3425 = sst [smem:[#allocation31_spill]] %s3407_s8 }
   0x7   :  { %3426 = sst [smem:[#allocation32_spill]] %s3408_s9 }
   0x8   :  { %14 = vsyncpa [#allocation7], 0 }
   0x9   :  { %16 = vsyncpa [#allocation7 + $0x1], 0 }
   0xa   :  { %17 = vsyncpa [#allocation10], 0 }
   0xb   :  { %18 = vsyncpa [#allocation13], 0 }
   0xc   :  { %19 = vsyncpa [#allocation8], 0 }
   0xd   :  { %21 = vsyncpa [#allocation8 + $0x1], 0  ;;  %s2929_s30 = smov 0   ;;  %s2931_s10 = smov 0  }
   0xe   :  { %s2933_s11 = smov 0   ;;  %s2935_s12 = smov 0  }
   0xf   :  { %s2937_s13 = smov 0   ;;  %s2939_s14 = smov 0  }
  0x10   :  { %s2941_s15 = smov 0   ;;  %s2943_s16 = smov 0  }
  0x11   :  { %s2945_s17 = smov 0   ;;  %s2947_s18 = smov 0  }
  0x12   :  { %s2949_s19 = smov 0  }
  0x13 LB: > { %3427 = sst [smem:[#allocation19_spill]] %s2830_s30  ;;  %s1853_s20 = sadd.s32 4294967295, %s2870_s19   ;;  %s2870_s19 = sphi %s2949_s19, %s27_s19   ;;  %s2866_s18 = sphi %s2947_s18, %s3464_s18   ;;  %s2862_s17 = sphi %s2945_s17, %s3455_s17   ;;  %s2858_s16 = sphi %s2943_s16, %s3463_s16   ;;  %s2854_s15 = sphi %s2941_s15, %s3454_s15   ;;  %s2850_s14 = sphi %s2939_s14, %s3462_s14   ;;  %s2846_s13 = sphi %s2937_s13, %s3461_s13   ;;  %s2842_s12 = sphi %s2935_s12, %s3460_s12   ;;  %s2838_s11 = sphi %s2933_s11, %s3459_s11   ;;  %s2834_s10 = sphi %s2931_s10, %s3458_s10   ;;  %s2830_s30 = sphi %s2929_s30, %s3457_s30  }
  0x14   : > { %3428 = sst [smem:[#allocation20_spill]] %s2858_s16  ;;  %s1854_s21 = sadd.s32 4294967294, %s2870_s19  }
  0x15   : > { %3429 = sst [smem:[#allocation21_spill]] %s2862_s17  ;;  %p59_p0 = scmp.ne.s32.totalorder %s2846_s13, %s2842_s12 }
  0x16   : > { %p2985_p1 = scmp.eq.s32.totalorder %s1853_s20, 0  ;;  %p252_p2 = scmp.ne.s32.totalorder %s2838_s11, %s2834_s10 }
  0x17   : > { %p253_p3 = scmp.eq.s32.totalorder %s1853_s20, 7  ;;  %p258_p5 = scmp.ne.s32.totalorder %s2834_s10, %s2830_s30 }
  0x18   : > { %p2993_p4 = por %p2985_p1, %p59_p0  ;;  %p259_p7 = scmp.eq.s32.totalorder %s1854_s21, 7 }
  0x19   : > { %p2999_p6 = por %p253_p3, %p252_p2  ;;  %p1855_p8 = scmp.ge.s32.totalorder %s2870_s19, 1 }
  0x1a   : > { %p266_p9 = scmp.lt.s32.totalorder %s2870_s19, 9  ;;  %p3005_p10 = por %p259_p7, %p258_p5 }
  0x1b   : > { %s3432_s24 = scalar_select %p2999_p6, 1, 0 }
  0x1c   : > { %s3434_s25 = scalar_select %p3005_p10, 1, 0 }
  0x1d   : > { %3433 = sst [smem:[#allocation22_spill]] %s3432_s24  ;;  %p3009_p11 = pnand %p1855_p8, %p266_p9 }
  0x1e   : > { %3435 = sst [smem:[#allocation23_spill]] %s3434_s25  ;;  %s2872_s12 = smov [#allocation9]  }
  0x1f   : > { %s3437_s5 = sld [smem:[#allocation28_spill]]  ;;  %p2478_p12 = pneg %p3009_p11 }
  0x20   : > { %s291_s20 = sshll.u32 %s2872_s12, 4  ;;  %s3439_s6 = sld [smem:[#allocation29_spill]]  ;;  %s292_s20 = int_to_ptr.vmem [resolvable:$true] %s291_s20 }
  0x21   : > { %p3020_p13 = pnand %p2478_p12, %p2985_p1  ;;  %s3414_s28 = smov 64  }
  0x22   : > { %s3440_s7 = sld [smem:[#allocation30_spill]]  ;;  %s2875_s25 = smov [#allocation11]  }
  0x23   : > { %s2876_s9 = smov [#allocation12]   ;;  %s36_s24 = sadd.s32 1, %s2862_s17 }
  0x24   : > { %p37_p0 = scmp.ge.s32.totalorder %s36_s24, 4  ;;  %s46_s12 = sadd.s32 1, %s2850_s14 }
  0x25   : > { %s289_s29 = sshll.u32 %s3437_s5, 4  ;;  %s3415_s5 = smov 4   ;;  %s290_s29 = int_to_ptr.hbm [resolvable:$true] %s289_s29 }
  0x26   : > { %s303_s27 = sshll.u32 %s3439_s6, 4  ;;  %s305_s6 = sshll.u32 %s2875_s25, 4  ;;  %s304_s27 = int_to_ptr.hbm [resolvable:$true] %s303_s27  ;;  %s306_s6 = int_to_ptr.vmem [resolvable:$true] %s305_s6 }
  0x27   : > { %2481 = dma.hbm_to_vmem [thread:$0]  (!%p3020_p13), %s290_s29, 2048, %s292_s20, [#allocation10], %s3414_s28, %s3414_s28, %s3415_s5  }
  0x28   : > { %s317_s30 = sshll.u32 %s3440_s7, 4  ;;  %s319_s29 = sshll.u32 %s2876_s9, 4  ;;  %s318_s30 = int_to_ptr.hbm [resolvable:$true] %s317_s30  ;;  %s320_s29 = int_to_ptr.vmem [resolvable:$true] %s319_s29 }
  0x29   : > { %2484 = dma.hbm_to_vmem [thread:$0]  (!%p3020_p13), %s304_s27, 2048, %s306_s6, [#allocation10], %s3414_s28, %s3414_s28, %s3415_s5  }
  0x2a   : > { %2487 = dma.hbm_to_vmem [thread:$0]  (!%p3020_p13), %s318_s30, 2048, %s320_s29, [#allocation13], %s3414_s28, %s3414_s28, %s3415_s5  }
  0x2b   : > { %s39_s20 = sadd.s32 1, %s2866_s18  ;;  %p53_p2 = scmp.ne.s32.totalorder %s2850_s14, %s2846_s13 }
  0x2c   : > { %p54_p3 = scmp.eq.s32.totalorder %s2870_s19, 0  ;;  %s3466_s24 = smov (%p37_p0, %s36_s24), 0 }
  0x2d   : > { %3441 = sst [smem:[#allocation24_spill]] %s3466_s24  ;;  %s3468_s20 = smov (!%p37_p0, %s39_s20), %s2866_s18 }
  0x2e   : > { %p3054_p5 = por %p54_p3, %p53_p2  ;;  %s238_s9 = ssub.s32 %s2862_s17, %s3466_s24 }
  0x2f   : > { %p41_p7 = scmp.ge.s32.totalorder %s3468_s20, 2  ;;  %s242_s21 = sadd.s32 1, %s2838_s11 }
  0x30   : > { %p2499_p8 = scmp.lt.s32.totalorder %s2870_s19, 8  ;;  %s336_s27 = sand.u32 1, %s2850_s14  }
  0x31   : > { %s3470_s20 = smov (%p41_p7, %s3468_s20), 0  ;;  %s1860_s30 = sshll.u32 %s336_s27, 5 }
  0x32   : > { %3443 = sst [smem:[#allocation25_spill]] %s3470_s20  ;;  %s43_s25 = ssub.s32 %s2866_s18, %s3470_s20 }
  0x33   : > { %p44_p9 = scmp.eq.s32.totalorder %s43_s25, 0  ;;  %s239_s29 = sor.u32 %s238_s9, %s43_s25 }
  0x34   : > { %p240_p12 = scmp.eq.s32.totalorder %s239_s29, 0  ;;  %s2250_s28 = sshll.u32 %s2866_s18, 5 }
  0x35   : > { %s3069_s5 = scalar_select %p44_p9, %s2850_s14, %s46_s12  }
  0x36   : > { %s3072_s7 = scalar_select %p240_p12, %s2838_s11, %s242_s21  }
  0x37   : > { %s345_s8 = scalar_lea.hbm %s3399_s0, %s2250_s28  ;;  %s340_s16 = scalar_lea.vmem [#allocation6], %s1860_s30 }
  0x38   : > { %s348_s4 = sshll.u32 %s340_s16, 4  ;;  %s346_s2 = sshll.u32 %s345_s8, 4  ;;  %s349_s4 = int_to_ptr.vmem [resolvable:$true] %s348_s4  ;;  %s347_s2 = int_to_ptr.hbm [resolvable:$true] %s346_s2 }
  0x39   : > { %p2489_p13 = pnand %p2499_p8, %p3054_p5  ;;  %s337_s20 = scalar_lea.sflag [#allocation7], %s336_s27 }
  0x3a   : > { %s3444_s9 = smov 4   ;;  %s3445_s25 = smov 64  }
  0x3b   : > { %2491 = dma.hbm_to_vmem [thread:$0]  (!%p2489_p13), %s347_s2, 512, %s349_s4, %s337_s20, %s3445_s25, %s3445_s25, %s3444_s9  }
  0x3c   : > { %360 = sbr.rel (%p3009_p11) target bundleno = 1914 (0x77a), region = 56  ;;  %s362_s17 = sand.u32 (!%p3009_p11), 1, %s2846_s13  }
  0x3d   : > { %s1864_s28 = sshll.u32 (!%p3009_p11), %s362_s17, 5  ;;  %s363_s24 = scalar_lea.sflag (!%p3009_p11), [#allocation7], %s362_s17 }
  0x3e   : > { %s3087_s16 = scalar_lea.vmem (!%p3009_p11), [#allocation6], %s1864_s28 }
  0x41   : > { %2813 = dma.done.wait (%p2993_p4), %s363_s24, 512  }
  0x42   : > { %2815 = vsyncadd (%p2993_p4), %s363_s24, 4294966784 }
  0x43   : > { %2817 = dma.done.wait (%p2985_p1), [#allocation10], 4096  }
  0x44   : > { %2819 = vsyncadd (%p2985_p1), [#allocation10], 4294963200 }
  0x45   : > { %2821 = dma.done.wait (%p2985_p1), [#allocation13], 2048  }
  0x46   : > { %2823 = vsyncadd (%p2985_p1), [#allocation13], 4294965248  ;;  %s414_s2 = sand.u32 1, %s2834_s10   ;;  %p1869_p4 = scmp.ne.s32.totalorder %s2854_s15, 0 }
  0x47   : > { %s1868_s4 = sshll.u32 %s414_s2, 4  ;;  %s3446_s22 = sld [smem:[#allocation26_spill]] (!%p1869_p4) }
  0x48   : > { %s3104_s8 = scalar_lea.vmem [#allocation14], %s1868_s4  ;;  %422 = sbr.rel (%p1869_p4) target bundleno = 900 (0x384), region = 76 }
  0x4d   : > { %v454_v0 = vld [vmem:[%s3402_s3 + $0x78] sm:$0xff]  ;;  %v453_v1 = vld [vmem:[%s3402_s3 + $0x70] sm:$0xff]  ;;  %v452_v2 = vld [vmem:[%s3402_s3 + $0x68] sm:$0xff]  ;;  %vm489_vm0 = vcmask 261120  }
  0x4e   : > { %468 = vmatpush.msra.mxu0 %v454_v0  ;;  %591 = vmatpush.msra.mxu2 %v454_v0  ;;  %v451_v3 = vld [vmem:[%s3402_s3 + $0x60] sm:$0xff]  ;;  %v2431_v5 = vld [vmem:[%s3087_s16 + $0x8] sm:$0xff]   ;;  %v450_v6 = vld [vmem:[%s3402_s3 + $0x58] sm:$0xff] }
  0x4f   : > { %1870 = vmatpush.xpose.msk.msra.mxu1 %vm489_vm0, %v454_v0  ;;  %1887 = vmatpush.xpose.msk.msra.mxu3 %vm489_vm0, %v454_v0  ;;  %v2332_v4 = vld [vmem:[%s3087_s16] sm:$0xff]   ;;  %v3130_v9 = vunpack.c.l.bf16 %v2431_v5  ;;  %v2432_v10 = vld [vmem:[%s3087_s16 + $0x10] sm:$0xff]   ;;  %v3137_v12 = vunpack.c.h.bf16 %v2431_v5  ;;  %v2433_v17 = vld [vmem:[%s3087_s16 + $0x18] sm:$0xff]  }
  0x50   : > { %469 = vmatpush.msra.mxu0 %v453_v1  ;;  %592 = vmatpush.msra.mxu2 %v453_v1  ;;  %v3126_v7 = vunpack.c.l.bf16 %v2332_v4  ;;  %v3128_v8 = vunpack.c.h.bf16 %v2332_v4  ;;  %v449_v11 = vld [vmem:[%s3402_s3 + $0x50] sm:$0xff]  ;;  %v448_v14 = vld [vmem:[%s3402_s3 + $0x48] sm:$0xff]  ;;  %v3145_v15 = vunpack.c.l.bf16 %v2432_v10  ;;  %v447_v18 = vld [vmem:[%s3402_s3 + $0x40] sm:$0xff]  ;;  %v3153_v19 = vunpack.c.h.bf16 %v2432_v10 }
  0x51   : > { %v446_v21 = vld [vmem:[%s3402_s3 + $0x38] sm:$0xff]  ;;  %v3160_v22 = vunpack.c.l.bf16 %v2433_v17  ;;  %v445_v24 = vld [vmem:[%s3402_s3 + $0x30] sm:$0xff]  ;;  %v3167_v25 = vunpack.c.h.bf16 %v2433_v17  ;;  %v444_v27 = vld [vmem:[%s3402_s3 + $0x28] sm:$0xff] }
  0x52   : > { %470 = vmatpush.msra.mxu0 %v452_v2  ;;  %593 = vmatpush.msra.mxu2 %v452_v2  ;;  %v455_v13 = vadd.f32 %v3128_v8, %v3126_v7  ;;  %v443_v29 = vld [vmem:[%s3402_s3 + $0x20] sm:$0xff]  ;;  %v442_v31 = vld [vmem:[%s3402_s3 + $0x18] sm:$0xff]  ;;  %v441_v33 = vld [vmem:[%s3402_s3 + $0x10] sm:$0xff] }
  0x53   : > { %1871 = vmatpush.xpose.msk.msra.mxu1 %vm489_vm0, %v453_v1  ;;  %1888 = vmatpush.xpose.msk.msra.mxu3 %vm489_vm0, %v453_v1  ;;  %v440_v35 = vld [vmem:[%s3402_s3 + $0x8] sm:$0xff]  ;;  %v439_v37 = vld [vmem:[%s3402_s3] sm:$0xff] }
  0x54   : > { %471 = vmatpush.msra.mxu0 %v451_v3  ;;  %594 = vmatpush.msra.mxu2 %v451_v3  ;;  %v456_v16 = vadd.f32 %v3130_v9, %v455_v13  ;;  %v3227_v17 = vld [vmem:[#allocation9 + $0x78] sm:$0xff] }
  0x56   : > { %472 = vmatpush.msra.mxu0 %v450_v6  ;;  %595 = vmatpush.msra.mxu2 %v450_v6  ;;  %v457_v20 = vadd.f32 %v3137_v12, %v456_v16  ;;  %v2266_v16 = vld [vmem:[#allocation11 + $0x38] sm:$0xff] }
  0x57   : > { %1872 = vmatpush.xpose.msk.msra.mxu1 %vm489_vm0, %v452_v2  ;;  %1889 = vmatpush.xpose.msk.msra.mxu3 %vm489_vm0, %v452_v2 }
  0x58   : > { %473 = vmatpush.msra.mxu0 %v449_v11  ;;  %596 = vmatpush.msra.mxu2 %v449_v11  ;;  %v458_v23 = vadd.f32 %v3145_v15, %v457_v20  ;;  %v2257_v20 = vld [vmem:[#allocation9 + $0x30] sm:$0xff] }
  0x5a   : > { %474 = vmatpush.msra.mxu0 %v448_v14  ;;  %597 = vmatpush.msra.mxu2 %v448_v14  ;;  %v459_v26 = vadd.f32 %v3153_v19, %v458_v23  ;;  %v3233_v23 = vld [vmem:[#allocation9 + $0x70] sm:$0xff] }
  0x5b   : > { %1873 = vmatpush.xpose.msk.msra.mxu1 %vm489_vm0, %v451_v3  ;;  %1890 = vmatpush.xpose.msk.msra.mxu3 %vm489_vm0, %v451_v3 }
  0x5c   : > { %475 = vmatpush.msra.mxu0 %v447_v18  ;;  %598 = vmatpush.msra.mxu2 %v447_v18  ;;  %v460_v28 = vadd.f32 %v3160_v22, %v459_v26  ;;  %v2256_v26 = vld [vmem:[#allocation9 + $0x28] sm:$0xff] }
  0x5e   : > { %476 = vmatpush.msra.mxu0 %v446_v21  ;;  %599 = vmatpush.msra.mxu2 %v446_v21  ;;  %v461_v30 = vadd.f32 %v3167_v25, %v460_v28  ;;  %v3239_v28 = vld [vmem:[#allocation9 + $0x68] sm:$0xff] }
  0x5f   : > { %1874 = vmatpush.xpose.msk.msra.mxu1 %vm489_vm0, %v450_v6  ;;  %1891 = vmatpush.xpose.msk.msra.mxu3 %vm489_vm0, %v450_v6 }
  0x60   : > { %477 = vmatpush.msra.mxu0 %v445_v24  ;;  %600 = vmatpush.msra.mxu2 %v445_v24  ;;  %v462_v32 = vrot.slane %v461_v30, 4 }
  0x62   : > { %478 = vmatpush.msra.mxu0 %v444_v27  ;;  %601 = vmatpush.msra.mxu2 %v444_v27  ;;  %v463_v34 = vadd.f32 %v462_v32, %v461_v30  ;;  %v2255_v32 = vld [vmem:[#allocation9 + $0x20] sm:$0xff] }
  0x63   : > { %1875 = vmatpush.xpose.msk.msra.mxu1 %vm489_vm0, %v449_v11  ;;  %1892 = vmatpush.xpose.msk.msra.mxu3 %vm489_vm0, %v449_v11 }
  0x64   : > { %479 = vmatpush.msra.mxu0 %v443_v29  ;;  %602 = vmatpush.msra.mxu2 %v443_v29  ;;  %v464_v36 = vrot.slane %v463_v34, 2 }
  0x66   : > { %480 = vmatpush.msra.mxu0 %v442_v31  ;;  %603 = vmatpush.msra.mxu2 %v442_v31  ;;  %v465_v38 = vadd.f32 %v464_v36, %v463_v34  ;;  %v2271_v34 = vld [vmem:[#allocation9 + $0x60] sm:$0xff] }
  0x67   : > { %1876 = vmatpush.xpose.msk.msra.mxu1 %vm489_vm0, %v448_v14  ;;  %1893 = vmatpush.xpose.msk.msra.mxu3 %vm489_vm0, %v448_v14  ;;  %v2258_v14 = vld [vmem:[#allocation9 + $0x38] sm:$0xff] }
  0x68   : > { %481 = vmatpush.msra.mxu0 %v441_v33  ;;  %604 = vmatpush.msra.mxu2 %v441_v33  ;;  %v466_v39 = vrot.slane %v465_v38, 1 }
  0x6a   : > { %482 = vmatpush.msra.mxu0 %v440_v35  ;;  %605 = vmatpush.msra.mxu2 %v440_v35  ;;  %v467_v40 = vadd.f32 %v466_v39, %v465_v38  ;;  %v2262_v38 = vld [vmem:[#allocation11 + $0x18] sm:$0xff] }
  0x6b   : > { %1877 = vmatpush.xpose.msk.msra.mxu1 %vm489_vm0, %v447_v18  ;;  %1894 = vmatpush.xpose.msk.msra.mxu3 %vm489_vm0, %v447_v18  ;;  %v3229_v18 = vld [vmem:[#allocation11 + $0x78] sm:$0xff] }
  0x6c   : > { %483 = vmatpush.msra.mxu0 %v439_v37  ;;  %606 = vmatpush.msra.mxu2 %v439_v37  ;;  %v2270_v39 = vld [vmem:[#allocation9 + $0x58] sm:$0xff] }
  0x6d   : > { %484 = vmatmul.f32.vlgmr.msra.gmra.mxu0 %v467_v40  ;;  %v2278_v40 = vld [vmem:[#allocation11 + $0x58] sm:$0xff] }
  0x6e   : > { %741 = vmatpush.bf16.msrb.mxu0 %v2258_v14  ;;  %850 = vmatpush.bf16.msrb.mxu2 %v2266_v16 }
  0x6f   : > { %1878 = vmatpush.xpose.msk.msra.mxu1 %vm489_vm0, %v446_v21  ;;  %1895 = vmatpush.xpose.msk.msra.mxu3 %vm489_vm0, %v446_v21  ;;  %v2265_v21 = vld [vmem:[#allocation11 + $0x30] sm:$0xff] }
  0x72   : > { %742 = vmatpush.bf16.msrb.mxu0 %v2257_v20  ;;  %851 = vmatpush.bf16.msrb.mxu2 %v2265_v21 }
  0x73   : > { %1879 = vmatpush.xpose.msk.msra.mxu1 %vm489_vm0, %v445_v24  ;;  %1896 = vmatpush.xpose.msk.msra.mxu3 %vm489_vm0, %v445_v24  ;;  %v3235_v24 = vld [vmem:[#allocation11 + $0x70] sm:$0xff] }
  0x76   : > { %743 = vmatpush.bf16.msrb.mxu0 %v2256_v26 }
  0x77   : > { %1880 = vmatpush.xpose.msk.msra.mxu1 %vm489_vm0, %v444_v27  ;;  %1897 = vmatpush.xpose.msk.msra.mxu3 %vm489_vm0, %v444_v27  ;;  %v2264_v27 = vld [vmem:[#allocation11 + $0x28] sm:$0xff] }
  0x78   : > { %852 = vmatpush.bf16.msrb.mxu2 %v2264_v27 }
  0x7a   : > { %744 = vmatpush.bf16.msrb.mxu0 %v2255_v32 }
  0x7b   : > { %1881 = vmatpush.xpose.msk.msra.mxu1 %vm489_vm0, %v443_v29  ;;  %1898 = vmatpush.xpose.msk.msra.mxu3 %vm489_vm0, %v443_v29  ;;  %v3241_v29 = vld [vmem:[#allocation11 + $0x68] sm:$0xff] }
  0x7f   : > { %1882 = vmatpush.xpose.msk.msra.mxu1 %vm489_vm0, %v442_v31  ;;  %1899 = vmatpush.xpose.msk.msra.mxu3 %vm489_vm0, %v442_v31 }
  0x83   : > { %1883 = vmatpush.xpose.msk.msra.mxu1 %vm489_vm0, %v441_v33  ;;  %1900 = vmatpush.xpose.msk.msra.mxu3 %vm489_vm0, %v441_v33  ;;  %v2263_v33 = vld [vmem:[#allocation11 + $0x20] sm:$0xff] }
  0x84   : > { %853 = vmatpush.bf16.msrb.mxu2 %v2263_v33 }
  0x87   : > { %1884 = vmatpush.xpose.msk.msra.mxu1 %vm489_vm0, %v440_v35  ;;  %1901 = vmatpush.xpose.msk.msra.mxu3 %vm489_vm0, %v440_v35  ;;  %v2279_v35 = vld [vmem:[#allocation11 + $0x60] sm:$0xff] }
  0x88   : > { %854 = vmatpush.bf16.msrb.mxu2 %v2262_v38 }
  0x8b   : > { %1885 = vmatpush.xpose.msk.msra.mxu1 %vm489_vm0, %v439_v37  ;;  %1902 = vmatpush.xpose.msk.msra.mxu3 %vm489_vm0, %v439_v37  ;;  %v2254_v37 = vld [vmem:[#allocation9 + $0x18] sm:$0xff] }
  0x8c   : > { %745 = vmatpush.bf16.msrb.mxu0 %v2254_v37 }
  0x8f   : > { %2446 = vmatpush.bf16.msrb.mxu1 %v3227_v17  ;;  %2454 = vmatpush.bf16.msrb.mxu3 %v3229_v18 }
  0x93   : > { %2447 = vmatpush.bf16.msrb.mxu1 %v3233_v23  ;;  %2455 = vmatpush.bf16.msrb.mxu3 %v3235_v24 }
  0x97   : > { %2448 = vmatpush.bf16.msrb.mxu1 %v3239_v28  ;;  %2456 = vmatpush.bf16.msrb.mxu3 %v3241_v29 }
  0x9b   : > { %2449 = vmatpush.bf16.msrb.mxu1 %v2271_v34  ;;  %2457 = vmatpush.bf16.msrb.mxu3 %v2279_v35 }
  0x9f   : > { %2450 = vmatpush.bf16.msrb.mxu1 %v2270_v39  ;;  %2458 = vmatpush.bf16.msrb.mxu3 %v2278_v40 }
  0xea   : > { %v485_v41 = vpop.f32.mrf.mxu0 }
  0xeb   : > { %v488_v42 = vmul.f32 0.015625, %v485_v41 }
  0xed   : > { %1886 = vmatmul.msk.f32.vlgmr.msra.gmra.mxu1 %vm489_vm0, %v488_v42 }
 0x16a   : > { %v3216_v43 = vpop.f32.mrf.mxu1 }
 0x16b   : > { %v561_v44 = vperm.slane %v3216_v43, 0 }
 0x16d   : > { %v562_v45 = vsub.f32 %v3126_v7, %v561_v44  ;;  %v563_v46 = vsub.f32 %v3128_v8, %v561_v44  ;;  %v564_v47 = vsub.f32 %v3130_v9, %v561_v44  ;;  %v565_v48 = vsub.f32 %v3137_v12, %v561_v44 }
 0x16e   : > { %v566_v51 = vsub.f32 %v3145_v15, %v561_v44  ;;  %v567_v54 = vsub.f32 %v3153_v19, %v561_v44  ;;  %v568_v57 = vsub.f32 %v3160_v22, %v561_v44  ;;  %v569_v60 = vsub.f32 %v3167_v25, %v561_v44 }
 0x16f   : > { %v570_v49 = vmul.f32 %v562_v45, %v562_v45  ;;  %v571_v50 = vmul.f32 %v563_v46, %v563_v46  ;;  %v572_v52 = vmul.f32 %v564_v47, %v564_v47  ;;  %v573_v55 = vmul.f32 %v565_v48, %v565_v48 }
 0x170   : > { %v574_v58 = vmul.f32 %v566_v51, %v566_v51  ;;  %v575_v61 = vmul.f32 %v567_v54, %v567_v54  ;;  %v576_v63 = vmul.f32 %v568_v57, %v568_v57  ;;  %v577_v1 = vmul.f32 %v569_v60, %v569_v60  ;;  %v2269_v51 = vld [vmem:[#allocation9 + $0x50] sm:$0xff]  ;;  %v2260_v54 = vld [vmem:[#allocation11 + $0x8] sm:$0xff]  ;;  %v2251_v57 = vld [vmem:[#allocation9] sm:$0xff] }
 0x171   : > { %v578_v53 = vadd.f32 %v571_v50, %v570_v49  ;;  %v2253_v49 = vld [vmem:[#allocation9 + $0x10] sm:$0xff]  ;;  %2451 = vmatpush.bf16.msrb.mxu1 %v2269_v51  ;;  %v2275_v60 = vld [vmem:[#allocation11 + $0x40] sm:$0xff] }
 0x172   : > { %v2261_v50 = vld [vmem:[#allocation11 + $0x10] sm:$0xff]  ;;  %746 = vmatpush.bf16.msrb.mxu0 %v2253_v49 }
 0x173   : > { %v579_v56 = vadd.f32 %v578_v53, %v572_v52  ;;  %v2277_v52 = vld [vmem:[#allocation11 + $0x50] sm:$0xff]  ;;  %855 = vmatpush.bf16.msrb.mxu2 %v2261_v50  ;;  %v2252_v53 = vld [vmem:[#allocation9 + $0x8] sm:$0xff] }
 0x174   : > { %2459 = vmatpush.bf16.msrb.mxu3 %v2277_v52 }
 0x175   : > { %v580_v59 = vadd.f32 %v579_v56, %v573_v55  ;;  %v2268_v55 = vld [vmem:[#allocation9 + $0x48] sm:$0xff] }
 0x176   : > { %v2276_v56 = vld [vmem:[#allocation11 + $0x48] sm:$0xff]  ;;  %747 = vmatpush.bf16.msrb.mxu0 %v2252_v53  ;;  %2452 = vmatpush.bf16.msrb.mxu1 %v2268_v55 }
 0x177   : > { %v581_v62 = vadd.f32 %v580_v59, %v574_v58  ;;  %856 = vmatpush.bf16.msrb.mxu2 %v2260_v54  ;;  %v2259_v58 = vld [vmem:[#allocation11] sm:$0xff] }
 0x178   : > { %2460 = vmatpush.bf16.msrb.mxu3 %v2276_v56  ;;  %v2267_v59 = vld [vmem:[#allocation9 + $0x40] sm:$0xff] }
 0x179   : > { %v582_v0 = vadd.f32 %v581_v62, %v575_v61  ;;  %v646_v61 = vld [vmem:[%s3400_s1] sm:$0x1] }
 0x17a   : > { %748 = vmatpush.bf16.msrb.mxu0 %v2251_v57  ;;  %2453 = vmatpush.bf16.msrb.mxu1 %v2267_v59 }
 0x17b   : > { %v583_v2 = vadd.f32 %v582_v0, %v576_v63  ;;  %857 = vmatpush.bf16.msrb.mxu2 %v2259_v58  ;;  %v648_v0 = vld [vmem:[%s3446_s22] sm:$0x1] }
 0x17c   : > { %2461 = vmatpush.bf16.msrb.mxu3 %v2275_v60 }
 0x17d   : > { %v584_v3 = vadd.f32 %v583_v2, %v577_v1 }
 0x17e   : > { %960 = vmatpush.bf16.msra.mxu0 %v3227_v17 }
 0x17f   : > { %v585_v4 = vrot.slane %v584_v3, 4 }
 0x181   : > { %v586_v5 = vadd.f32 %v585_v4, %v584_v3 }
 0x182   : > { %961 = vmatpush.bf16.msra.mxu0 %v3233_v23 }
 0x183   : > { %v587_v6 = vrot.slane %v586_v5, 2 }
 0x185   : > { %v588_v10 = vadd.f32 %v587_v6, %v586_v5 }
 0x186   : > { %962 = vmatpush.bf16.msra.mxu0 %v3239_v28 }
 0x187   : > { %v589_v11 = vrot.slane %v588_v10, 1 }
 0x189   : > { %v590_v13 = vadd.f32 %v589_v11, %v588_v10 }
 0x18a   : > { %963 = vmatpush.bf16.msra.mxu0 %v2271_v34 }
 0x18b   : > { %607 = vmatmul.f32.vlgmr.msra.gmra.mxu2 %v590_v13 }
 0x18c   : > { %1071 = vmatpush.bf16.msra.mxu2 %v3229_v18 }
 0x18e   : > { %964 = vmatpush.bf16.msra.mxu0 %v2270_v39 }
 0x190   : > { %1072 = vmatpush.bf16.msra.mxu2 %v3235_v24 }
 0x192   : > { %965 = vmatpush.bf16.msra.mxu0 %v2269_v51 }
 0x194   : > { %1073 = vmatpush.bf16.msra.mxu2 %v3241_v29 }
 0x196   : > { %966 = vmatpush.bf16.msra.mxu0 %v2268_v55 }
 0x198   : > { %1074 = vmatpush.bf16.msra.mxu2 %v2279_v35 }
 0x19a   : > { %967 = vmatpush.bf16.msra.mxu0 %v2267_v59 }
 0x19c   : > { %1075 = vmatpush.bf16.msra.mxu2 %v2278_v40 }
 0x1a0   : > { %1076 = vmatpush.bf16.msra.mxu2 %v2277_v52 }
 0x1a4   : > { %1077 = vmatpush.bf16.msra.mxu2 %v2276_v56 }
 0x1a8   : > { %1078 = vmatpush.bf16.msra.mxu2 %v2275_v60 }
 0x20e   : > { %v608_v30 = vpop.f32.mrf.mxu2 }
 0x20f   : > { %v611_v31 = vmul.f32 0.015625, %v608_v30 }
 0x211   : > { %v612_v36 = vadd.f32 1e-05, %v611_v31 }
 0x213   : > { %2599 = vrsqrt.f32 %v612_v36  ;;  %vm619_vm2 = vweird.f32 %v612_v36 }
 0x219   : > { %v2600_v41 = vpop.eup %2599 }
 0x21a   : > { %v614_v42 = vmul.f32 %v2600_v41, %v612_v36  ;;  %vm620_vm1 = vweird.f32 %v2600_v41 }
 0x21b   : > { %vm621_vm3 = vmor %vm619_vm2, %vm620_vm1 }
 0x21c   : > { %v615_v44 = vmul.f32 %v2600_v41, %v614_v42 }
 0x21e   : > { %v616_v45 = vmul.f32 0.5, %v615_v44 }
 0x220   : > { %v617_v46 = vsub.f32 1.5, %v616_v45 }
 0x222   : > { %v618_v47 = vmul.f32 %v2600_v41, %v617_v46 }
 0x224   : > { %v622_v48 = vsel %vm621_vm3, %v2600_v41, %v618_v47 }
 0x225   : > { %1903 = vmatmul.msk.f32.vlgmr.msra.gmra.mxu3 %vm489_vm0, %v622_v48 }
 0x2a8   : > { %v643_v62 = vpop.f32.mrf.mxu3 }
 0x2a9   : > { %v647_v63 = vmul.f32 %v646_v61, %v643_v62 }
 0x2ab   : > { %v649_v1 = vmul.f32 %v647_v63, %v3216_v43  ;;  %651 = vst [vmem:[#allocation4] sm:$0x1] %v647_v63  ;;  %v653_v2 = vperm.slane %v647_v63, 0 }
 0x2ad   : > { %v650_v3 = vsub.f32 %v648_v0, %v649_v1  ;;  %v654_v4 = vmul.f32 %v3126_v7, %v653_v2  ;;  %v655_v6 = vmul.f32 %v3128_v8, %v653_v2  ;;  %v656_v10 = vmul.f32 %v3130_v9, %v653_v2 }
 0x2ae   : > { %v657_v11 = vmul.f32 %v3137_v12, %v653_v2  ;;  %v658_v7 = vmul.f32 %v3145_v15, %v653_v2  ;;  %v659_v8 = vmul.f32 %v3153_v19, %v653_v2  ;;  %v660_v12 = vmul.f32 %v3160_v22, %v653_v2 }
 0x2af   : > { %652 = vst [vmem:[#allocation5] sm:$0x1] %v650_v3  ;;  %v663_v5 = vperm.slane %v650_v3, 0  ;;  %v661_v23 = vmul.f32 %v3167_v25, %v653_v2 }
 0x2b1   : > { %v665_v13 = vadd.f32 %v663_v5, %v654_v4  ;;  %v666_v14 = vadd.f32 %v663_v5, %v655_v6  ;;  %v667_v16 = vadd.f32 %v663_v5, %v656_v10  ;;  %v668_v17 = vadd.f32 %v663_v5, %v657_v11 }
 0x2b2   : > { %v669_v20 = vadd.f32 %v663_v5, %v658_v7  ;;  %v670_v9 = vadd.f32 %v663_v5, %v659_v8  ;;  %v671_v24 = vadd.f32 %v663_v5, %v660_v12  ;;  %v672_v26 = vadd.f32 %v663_v5, %v661_v23 }
 0x2b3   : > { %v673_v43 = vpack.c.bf16 %v666_v14, %v665_v13  ;;  %v674_v18 = vpack.c.bf16 %v668_v17, %v667_v16 }
 0x2b4   : > { %v675_v21 = vpack.c.bf16 %v670_v9, %v669_v20  ;;  %v676_v27 = vpack.c.bf16 %v672_v26, %v671_v24 }
 0x2b5   : > { %749 = vmatmul.bf16.vlgmr.msrb.gmra.mxu0 %v673_v43  ;;  %858 = vmatmul.bf16.vlgmr.msrb.gmra.mxu2 %v673_v43 }
 0x2b6   : > { %973 = vmatmul.bf16.vlgmr.msrb.gmra.mxu1 %v674_v18  ;;  %1084 = vmatmul.bf16.vlgmr.msrb.gmra.mxu3 %v674_v18 }
 0x2c5   : > { %754 = vmatmul.bf16.gmra.mxu0 %v674_v18  ;;  %863 = vmatmul.bf16.gmra.mxu2 %v674_v18 }
 0x2c6   : > { %978 = vmatmul.bf16.gmra.mxu1 %v675_v21  ;;  %1089 = vmatmul.bf16.gmra.mxu3 %v675_v21 }
 0x2d5   : > { %759 = vmatmul.bf16.gmra.mxu0 %v675_v21  ;;  %868 = vmatmul.bf16.gmra.mxu2 %v675_v21 }
 0x2d6   : > { %983 = vmatmul.bf16.gmra.mxu1 %v676_v27  ;;  %1094 = vmatmul.bf16.gmra.mxu3 %v676_v27 }
 0x2e5   : > { %764 = vmatmul.bf16.gmra.mxu0 %v676_v27  ;;  %873 = vmatmul.bf16.gmra.mxu2 %v676_v27 }
 0x2f5   : > { %968 = vmatmul.bf16.vlgmr.msra.gmra.mxu0 %v673_v43  ;;  %1079 = vmatmul.bf16.vlgmr.msra.gmra.mxu2 %v673_v43 }
 0x332   : > { %v750_v15 = vpop.f32.mrf.mxu0 }
 0x333   : > { %v974_v19 = vpop.f32.mrf.mxu1 }
 0x338   : > { %v859_v28 = vpop.f32.mrf.mxu2 }
 0x339   : > { %v1085_v29 = vpop.f32.mrf.mxu3 }
 0x33a   : > { %v752_v30 = vpop.f32.mrf.mxu0 }
 0x33b   : > { %v2350_v31 = vpack.c.bf16 %v752_v30, %v750_v15  ;;  %v976_v22 = vpop.f32.mrf.mxu1 }
 0x33c   : > { %v2395_v32 = vpack.c.bf16 %v976_v22, %v974_v19 }
 0x33d   : > { %2351 = vst [vmem:[#allocation2 + $0x30] sm:$0xff] %v2350_v31  }
 0x33e   : > { %2440 = vst [vmem:[#allocation2 + $0x20] sm:$0xff] %v2395_v32  }
 0x340   : > { %v861_v25 = vpop.f32.mrf.mxu2 }
 0x341   : > { %v2370_v33 = vpack.c.bf16 %v861_v25, %v859_v28  ;;  %v1087_v34 = vpop.f32.mrf.mxu3 }
 0x342   : > { %v2415_v35 = vpack.c.bf16 %v1087_v34, %v1085_v29  ;;  %v755_v36 = vpop.f32.mrf.mxu0 }
 0x343   : > { %2371 = vst [vmem:[#allocation3] sm:$0xff] %v2370_v33   ;;  %v979_v37 = vpop.f32.mrf.mxu1 }
 0x344   : > { %2443 = vst [vmem:[#allocation3 + $0x8] sm:$0xff] %v2415_v35  }
 0x348   : > { %v864_v38 = vpop.f32.mrf.mxu2 }
 0x349   : > { %v1090_v39 = vpop.f32.mrf.mxu3 }
 0x34a   : > { %v757_v40 = vpop.f32.mrf.mxu0 }
 0x34b   : > { %v2355_v41 = vpack.c.bf16 %v757_v40, %v755_v36  ;;  %v981_v42 = vpop.f32.mrf.mxu1 }
 0x34c   : > { %v2400_v44 = vpack.c.bf16 %v981_v42, %v979_v37 }
 0x34d   : > { %2434 = vst [vmem:[#allocation2] sm:$0xff] %v2355_v41  }
 0x34e   : > { %2441 = vst [vmem:[#allocation2 + $0x28] sm:$0xff] %v2400_v44  }
 0x350   : > { %v866_v45 = vpop.f32.mrf.mxu2 }
 0x351   : > { %v2375_v46 = vpack.c.bf16 %v866_v45, %v864_v38  ;;  %v1092_v47 = vpop.f32.mrf.mxu3 }
 0x352   : > { %v2420_v48 = vpack.c.bf16 %v1092_v47, %v1090_v39  ;;  %v760_v49 = vpop.f32.mrf.mxu0 }
 0x353   : > { %2437 = vst [vmem:[#allocation3 + $0x18] sm:$0xff] %v2375_v46   ;;  %v984_v50 = vpop.f32.mrf.mxu1 }
 0x354   : > { %2444 = vst [vmem:[#allocation3 + $0x30] sm:$0xff] %v2420_v48  }
 0x358   : > { %v869_v51 = vpop.f32.mrf.mxu2 }
 0x359   : > { %v1095_v52 = vpop.f32.mrf.mxu3 }
 0x35a   : > { %v762_v53 = vpop.f32.mrf.mxu0 }
 0x35b   : > { %v2360_v54 = vpack.c.bf16 %v762_v53, %v760_v49  ;;  %v986_v55 = vpop.f32.mrf.mxu1 }
 0x35c   : > { %v2405_v56 = vpack.c.bf16 %v986_v55, %v984_v50 }
 0x35d   : > { %2435 = vst [vmem:[#allocation2 + $0x18] sm:$0xff] %v2360_v54  }
 0x35e   : > { %2442 = vst [vmem:[#allocation2 + $0x38] sm:$0xff] %v2405_v56  }
 0x360   : > { %v871_v57 = vpop.f32.mrf.mxu2 }
 0x361   : > { %v2380_v58 = vpack.c.bf16 %v871_v57, %v869_v51  ;;  %v1097_v59 = vpop.f32.mrf.mxu3 }
 0x362   : > { %v2425_v60 = vpack.c.bf16 %v1097_v59, %v1095_v52  ;;  %v765_v61 = vpop.f32.mrf.mxu0 }
 0x363   : > { %2438 = vst [vmem:[#allocation3 + $0x10] sm:$0xff] %v2380_v58  }
 0x364   : > { %2445 = vst [vmem:[#allocation3 + $0x38] sm:$0xff] %v2425_v60  }
 0x368   : > { %v874_v62 = vpop.f32.mrf.mxu2 }
 0x36a   : > { %v767_v63 = vpop.f32.mrf.mxu0 }
 0x36b   : > { %v2365_v0 = vpack.c.bf16 %v767_v63, %v765_v61 }
 0x36d   : > { %2436 = vst [vmem:[#allocation2 + $0x10] sm:$0xff] %v2365_v0  }
 0x370   : > { %v876_v1 = vpop.f32.mrf.mxu2 }
 0x371   : > { %v2385_v2 = vpack.c.bf16 %v876_v1, %v874_v62 }
 0x372   : > { %v969_v3 = vpop.f32.mrf.mxu0 }
 0x373   : > { %2439 = vst [vmem:[#allocation3 + $0x20] sm:$0xff] %v2385_v2  }
 0x378   : > { %v1080_v4 = vpop.f32.mrf.mxu2 }
 0x37a   : > { %v971_v5 = vpop.f32.mrf.mxu0 }
 0x37b   : > { %v2390_v6 = vpack.c.bf16 %v971_v5, %v969_v3 }
 0x37d   : > { %2391 = vst [vmem:[#allocation2 + $0x8] sm:$0xff] %v2390_v6  }
 0x380   : > { %v1082_v10 = vpop.f32.mrf.mxu2 }
 0x381   : > { %v2410_v11 = vpack.c.bf16 %v1082_v10, %v1080_v4 }
 0x383   : > { %2411 = vst [vmem:[#allocation3 + $0x28] sm:$0xff] %v2410_v11  }
 0x384 PF: > { %s3447_s27 = sld [smem:[#allocation27_spill]]  ;;  %s2032_s9 = sshll.u32 %s2854_s15, 4  ;;  %v2294_v16 = vld [vmem:[#allocation2 + $0x10] sm:$0xff]  ;;  %v2293_v18 = vld [vmem:[#allocation2 + $0x18] sm:$0xff]  ;;  %v2601_v21 = vld [vmem:[#allocation4] ss:$0 sm:$0xff] }
 0x385   : > { %s1118_s25 = sshra.s32 %s2032_s9, 3  ;;  %1262 = vmatpush.bf16.xpose.msra.mxu1 %v2294_v16  ;;  %v2292_v23 = vld [vmem:[#allocation2] sm:$0xff]  ;;  %v2291_v31 = vld [vmem:[#allocation2 + $0x30] sm:$0xff]  ;;  %vm1272_vm4 = vcmask 523264   ;;  %v2296_v48 = vld [vmem:[#allocation3 + $0x18] sm:$0xff]  ;;  %s3448_s9 = sld [smem:[#allocation20_spill]] }
 0x386   : > { %s2033_s24 = sshll.u32 %s1118_s25, 2  ;;  %v2602_v27 = vld [vmem:[#allocation5] ss:$0 sm:$0xff]  ;;  %v2297_v42 = vld [vmem:[#allocation3 + $0x10] sm:$0xff]  ;;  %v2310_v50 = vld [vmem:[#allocation2 + $0x38] sm:$0xff]  ;;  %s3449_s28 = sld [smem:[#allocation31_spill]] }
 0x387   : > { %s1121_s26 = scalar_lea.vmem %s3087_s16, %s2033_s24 [#allocation6]  ;;  %v2298_v41 = vld [vmem:[#allocation3 + $0x20] sm:$0xff]  ;;  %v2309_v51 = vld [vmem:[#allocation2 + $0x28] sm:$0xff]  ;;  %v2321_v16 = vld [vmem:[#allocation12 + $0x30] sm:$0xff]  ;;  %s2245_s24 = sshll.u32 %s2854_s15, 1 }
 0x388   : > { %v3284_v8 = vld [vmem:[%s1121_s26] sm:$0xff]   ;;  %1323 = vmatpush.bf16.msra.mxu2 %v2298_v41  ;;  %v2307_v53 = vld [vmem:[#allocation2 + $0x8] sm:$0xff]  ;;  %s3450_s22 = sld [smem:[#allocation32_spill]]  ;;  %s1732_s15 = sshll.u32 %s3104_s8, 4  ;;  %s1733_s15 = int_to_ptr.vmem [resolvable:$true] %s1732_s15 }
 0x389   : > { %v2429_v20 = vunpack.c.l.bf16 %v3284_v8  ;;  %v2430_v9 = vunpack.c.h.bf16 %v3284_v8  ;;  %v2295_v49 = vld [vmem:[#allocation3] sm:$0xff]  ;;  %s1718_s30 = scalar_lea.sflag [#allocation8], %s414_s2 }
 0x38a   : > { %v2290_v13 = vld [vmem:[%s3447_s27 + $0x38] sm:$0xff]  ;;  %v2289_v14 = vld [vmem:[%s3447_s27 + $0x30] sm:$0xff]  ;;  %v2288_v17 = vld [vmem:[%s3447_s27 + $0x28] sm:$0xff] }
 0x38b   : > { %1203 = vmatpush.bf16.msra.mxu0 %v2290_v13  ;;  %v2287_v43 = vld [vmem:[%s3447_s27 + $0x20] sm:$0xff]  ;;  %v2286_v7 = vld [vmem:[%s3447_s27 + $0x18] sm:$0xff]  ;;  %v2285_v12 = vld [vmem:[%s3447_s27 + $0x10] sm:$0xff]  ;;  %v1130_v24 = vmul.f32 %v2601_v21, %v2429_v20  ;;  %v1131_v26 = vmul.f32 %v2601_v21, %v2430_v9  ;;  %s2246_s4 = sshll.u32 %s3448_s9, 3 }
 0x38c   : > { %v2284_v15 = vld [vmem:[%s3447_s27 + $0x8] sm:$0xff]  ;;  %v2283_v29 = vld [vmem:[%s3447_s27] sm:$0xff]  ;;  %v2306_v22 = vld [vmem:[%s3447_s27 + $0x78] sm:$0xff]  ;;  %1324 = vmatpush.bf16.msra.mxu2 %v2297_v42  ;;  %s1729_s23 = sadd.s32 %s2246_s4, %s2245_s24 }
 0x38d   : > { %1263 = vmatpush.bf16.xpose.msra.mxu1 %v2293_v18  ;;  %v1136_v19 = vadd.f32 %v2602_v27, %v1130_v24  ;;  %v1137_v28 = vadd.f32 %v2602_v27, %v1131_v26  ;;  %1404 = vmatpush.bf16.msra.mxu3 %v2306_v22  ;;  %v2305_v32 = vld [vmem:[%s3447_s27 + $0x70] sm:$0xff]  ;;  %v2304_v25 = vld [vmem:[%s3447_s27 + $0x68] sm:$0xff]  ;;  %v2303_v33 = vld [vmem:[%s3447_s27 + $0x60] sm:$0xff]  ;;  %s2247_s26 = sshll.u32 %s1729_s23, 3 }
 0x38e   : > { %v2302_v34 = vld [vmem:[%s3447_s27 + $0x58] sm:$0xff]  ;;  %v2301_v35 = vld [vmem:[%s3447_s27 + $0x50] sm:$0xff]  ;;  %v2300_v37 = vld [vmem:[%s3447_s27 + $0x48] sm:$0xff]  ;;  %s1731_s6 = scalar_lea.hbm %s3450_s22, %s2247_s26 }
 0x38f   : > { %1204 = vmatpush.bf16.msra.mxu0 %v2289_v14  ;;  %v1138_v30 = vpack.c.bf16 %v1137_v28, %v1136_v19  ;;  %v2299_v40 = vld [vmem:[%s3447_s27 + $0x40] sm:$0xff]  ;;  %v2313_v18 = vld [vmem:[#allocation3 + $0x30] sm:$0xff]  ;;  %v2312_v21 = vld [vmem:[#allocation3 + $0x8] sm:$0xff]  ;;  %s1734_s21 = sshll.u32 %s1731_s6, 4  ;;  %s1735_s21 = int_to_ptr.hbm [resolvable:$true] %s1734_s21 }
 0x390   : > { %1325 = vmatpush.bf16.msra.mxu2 %v2296_v48  ;;  %v2308_v52 = vld [vmem:[#allocation2 + $0x20] sm:$0xff]  ;;  %v2317_v24 = vld [vmem:[#allocation12 + $0x10] sm:$0xff]  ;;  %v2316_v26 = vld [vmem:[#allocation12 + $0x8] sm:$0xff]  ;;  %s2754_s29 = sshra.s32 %s1735_s21, 4  ;;  %s2755_s29 = int_to_ptr.hbm [resolvable:$true] %s2754_s29 }
 0x391   : > { %1405 = vmatpush.bf16.msra.mxu3 %v2305_v32  ;;  %v2322_v14 = vld [vmem:[#allocation12 + $0x38] sm:$0xff]  ;;  %v2315_v27 = vld [vmem:[#allocation12] sm:$0xff]  ;;  %v2329_v48 = vld [vmem:[#allocation12 + $0x70] sm:$0xff]  ;;  %s2756_s9 = scalar_lea.hbm %s2755_s29, 16  ;;  %p2761_p2 = scmp.lt.s32.totalorder %s2755_s29, %s3450_s22 }
 0x392   : > { %p2757_p1 = scmp.ne.s32.totalorder %s2755_s29, %s2756_s9 }
 0x393   : > { %1205 = vmatpush.bf16.msra.mxu0 %v2288_v17  ;;  %v2314_v17 = vld [vmem:[#allocation3 + $0x38] sm:$0xff] }
 0x394   : > { %1326 = vmatpush.bf16.msra.mxu2 %v2295_v49  ;;  %v2328_v49 = vld [vmem:[#allocation12 + $0x68] sm:$0xff]  ;;  %p2758_p11 = pnand %p2757_p1, %p2999_p6 }
 0x395   : > { %1264 = vmatpush.bf16.xpose.msra.mxu1 %v2292_v23  ;;  %1406 = vmatpush.bf16.msra.mxu3 %v2304_v25  ;;  %v2311_v23 = vld [vmem:[#allocation3 + $0x28] sm:$0xff] }
 0x396   : > { %p2759_p0 = pneg %p2758_p11 }
 0x397   : > { %1206 = vmatpush.bf16.msra.mxu0 %v2287_v43  ;;  %v2320_v43 = vld [vmem:[#allocation12 + $0x28] sm:$0xff] }
 0x398   : > { %1465 = vmatpush.bf16.xpose.msrb.mxu2 %v2310_v50  ;;  %v2327_v50 = vld [vmem:[#allocation12 + $0x60] sm:$0xff] }
 0x399   : > { %1407 = vmatpush.bf16.msra.mxu3 %v2303_v33 }
 0x39b   : > { %1207 = vmatpush.bf16.msra.mxu0 %v2286_v7  ;;  %v2319_v7 = vld [vmem:[#allocation12 + $0x20] sm:$0xff] }
 0x39d   : > { %1265 = vmatpush.bf16.xpose.msra.mxu1 %v2291_v31  ;;  %1408 = vmatpush.bf16.msra.mxu3 %v2302_v34 }
 0x39f   : > { %1208 = vmatpush.bf16.msra.mxu0 %v2285_v12  ;;  %v2318_v12 = vld [vmem:[#allocation12 + $0x18] sm:$0xff] }
 0x3a0   : > { %1466 = vmatpush.bf16.xpose.msrb.mxu2 %v2309_v51  ;;  %v2326_v51 = vld [vmem:[#allocation12 + $0x58] sm:$0xff] }
 0x3a1   : > { %1409 = vmatpush.bf16.msra.mxu3 %v2301_v35 }
 0x3a3   : > { %1209 = vmatpush.bf16.msra.mxu0 %v2284_v15 }
 0x3a5   : > { %1410 = vmatpush.bf16.msra.mxu3 %v2300_v37  ;;  %1685 = vmatpush.bf16.msrb.mxu1 %v2322_v14 }
 0x3a7   : > { %1210 = vmatpush.bf16.msra.mxu0 %v2283_v29 }
 0x3a8   : > { %1467 = vmatpush.bf16.xpose.msrb.mxu2 %v2308_v52  ;;  %v2325_v52 = vld [vmem:[#allocation12 + $0x50] sm:$0xff] }
 0x3a9   : > { %1411 = vmatpush.bf16.msra.mxu3 %v2299_v40  ;;  %1686 = vmatpush.bf16.msrb.mxu1 %v2321_v16 }
 0x3aa   : > { %1211 = vmatmul.bf16.vlgmr.msra.gmra.mxu0 %v1138_v30 }
 0x3ab   : > { %1525 = vmatpush.bf16.msrb.mxu0 %v2314_v17 }
 0x3ac   : > { %1412 = vmatmul.bf16.vlgmr.msra.gmra.mxu3 %v1138_v30 }
 0x3ad   : > { %1687 = vmatpush.bf16.msrb.mxu1 %v2320_v43 }
 0x3af   : > { %1526 = vmatpush.bf16.msrb.mxu0 %v2313_v18 }
 0x3b0   : > { %1468 = vmatpush.bf16.xpose.msrb.mxu2 %v2307_v53  ;;  %v2324_v53 = vld [vmem:[#allocation12 + $0x48] sm:$0xff] }
 0x3b1   : > { %1688 = vmatpush.bf16.msrb.mxu1 %v2319_v7 }
 0x3b3   : > { %1527 = vmatpush.bf16.msrb.mxu0 %v2312_v21 }
 0x3b5   : > { %1689 = vmatpush.bf16.msrb.mxu1 %v2318_v12 }
 0x3b7   : > { %1528 = vmatpush.bf16.msrb.mxu0 %v2311_v23 }
 0x3b9   : > { %1690 = vmatpush.bf16.msrb.mxu1 %v2317_v24 }
 0x3bd   : > { %1691 = vmatpush.bf16.msrb.mxu1 %v2316_v26 }
 0x3c1   : > { %1692 = vmatpush.bf16.msrb.mxu1 %v2315_v27 }
 0x427   : > { %v1212_v36 = vpop.f32.mrf.mxu0 }
 0x42f   : > { %v1214_v38 = vpop.f32.mrf.mxu0  ;;  %v1413_v0 = vpop.f32.mrf.mxu3 }
 0x430   : > { %v1217_v39 = vpack.c.bf16 %v1214_v38, %v1212_v36 }
 0x432   : > { %1266 = vmatmul.bf16.vlgmr.msra.gmra.mxu1 %v1217_v39 }
 0x437   : > { %v1415_v1 = vpop.f32.mrf.mxu3 }
 0x438   : > { %v1418_v2 = vpack.c.bf16 %v1415_v1, %v1413_v0 }
 0x4af   : > { %v1267_v44 = vpop.f32.mrf.mxu1 }
 0x4b0   : > { %v1273_v45 = vsel %vm1272_vm4, %v1267_v44, -inf }
 0x4b1   : > { %1274 = vmax.xlane.f32.xlu0 %v1273_v45 }
 0x4b7   : > { %v1269_v46 = vpop.f32.mrf.mxu1 }
 0x4b8   : > { %v1276_v47 = vsel %vm1272_vm4, %v1269_v46, -inf }
 0x4b9   : > { %1277 = vmax.xlane.f32.xlu0 %v1276_v47  ;;  %v2330_v47 = vld [vmem:[#allocation12 + $0x78] sm:$0xff] }
 0x4ba   : > { %1699 = vmatpush.bf16.msrb.mxu3 %v2330_v47 }
 0x4be   : > { %1700 = vmatpush.bf16.msrb.mxu3 %v2329_v48 }
 0x4c2   : > { %1701 = vmatpush.bf16.msrb.mxu3 %v2328_v49 }
 0x4c6   : > { %1702 = vmatpush.bf16.msrb.mxu3 %v2327_v50 }
 0x4ca   : > { %1703 = vmatpush.bf16.msrb.mxu3 %v2326_v51 }
 0x4ce   : > { %1704 = vmatpush.bf16.msrb.mxu3 %v2325_v52 }
 0x4d2   : > { %1705 = vmatpush.bf16.msrb.mxu3 %v2324_v53 }
 0x524   : > { %v1275_v54 = vpop.xlane.xlu0 %1274 }
 0x525   : > { %v1279_v55 = vsub.f32 %v1267_v44, %v1275_v54  ;;  %v2323_v54 = vld [vmem:[#allocation12 + $0x40] sm:$0xff] }
 0x526   : > { %1706 = vmatpush.bf16.msrb.mxu3 %v2323_v54 }
 0x527   : > { %v1281_v56 = vmul.f32 1.442695, %v1279_v55 }
 0x529   : > { %2604 = vpow2.f32 %v1281_v56 }
 0x52c   : > { %v1278_v57 = vpop.xlane.xlu0 %1277 }
 0x52d   : > { %v1280_v58 = vsub.f32 %v1269_v46, %v1278_v57 }
 0x52f   : > { %v2605_v59 = vpop.eup %2604  ;;  %v1283_v60 = vmul.f32 1.442695, %v1280_v58 }
 0x530   : > { %v1285_v61 = vsel %vm1272_vm4, %v2605_v59, 0.0 }
 0x531   : > { %2606 = vpow2.f32 %v1283_v60  ;;  %1286 = vadd.xlane.f32.xlu0 %v1285_v61 }
 0x537   : > { %v2607_v62 = vpop.eup %2606 }
 0x538   : > { %v1291_v63 = vpack.c.bf16 %v2607_v62, %v2605_v59  ;;  %v1288_v13 = vsel %vm1272_vm4, %v2607_v62, 0.0 }
 0x53a   : > { %2098 = vmatmul.msk.bf16.vlgmr.msra.gmra.mxu2 %vm1272_vm4, %v1291_v63 }
 0x54a   : > { %1469 = vmatmul.bf16.vlgmr.msrb.gmra.mxu2 %v1418_v2 }
 0x5a4   : > { %v1287_v30 = vpop.xlane.xlu0 %1286 }
 0x5bd   : > { %v1328_v3 = vpop.f32.mrf.mxu2 }
 0x5c5   : > { %v1330_v4 = vpop.f32.mrf.mxu2 }
 0x5cd   : > { %v1470_v5 = vpop.f32.mrf.mxu2 }
 0x5ce   : > { %v1475_v6 = vsel %vm1272_vm4, %v1470_v5, -inf }
 0x5cf   : > { %1476 = vmax.xlane.f32.xlu1 %v1475_v6 }
 0x5d5   : > { %v1472_v10 = vpop.f32.mrf.mxu2 }
 0x5d6   : > { %v1478_v11 = vsel %vm1272_vm4, %v1472_v10, -inf }
 0x5d7   : > { %1479 = vmax.xlane.f32.xlu1 %v1478_v11 }
 0x5df   : > { %1289 = vadd.xlane.f32.xlu1 %v1288_v13 }
 0x642   : > { %v1477_v15 = vpop.xlane.xlu1 %1476 }
 0x643   : > { %v1481_v19 = vsub.f32 %v1470_v5, %v1477_v15  ;;  %v2603_v5 = vld [vmem:[%s3449_s28] ss:$0 sm:$0xff]  ;;  %s2760_s28 = scalar_lea.hbm %s3450_s22, 128 }
 0x644   : > { %p2762_p3 = scmp.lt.s32.totalorder %s2760_s28, %s2756_s9 }
 0x645   : > { %v1483_v28 = vmul.f32 1.442695, %v1481_v19 }
 0x646   : > { %p2763_p5 = por %p2762_p3, %p2761_p2 }
 0x647   : > { %2608 = vpow2.f32 %v1483_v28 }
 0x648   : > { %2610 = vrcp.f32 %v1287_v30  ;;  %p2764_p7 = pnand %p2763_p5, %p2759_p0 }
 0x64a   : > { %v1480_v29 = vpop.xlane.xlu1 %1479 }
 0x64b   : > { %v1482_v31 = vsub.f32 %v1472_v10, %v1480_v29 }
 0x64d   : > { %v2609_v22 = vpop.eup %2608  ;;  %v1485_v32 = vmul.f32 1.442695, %v1482_v31 }
 0x64e   : > { %v1487_v25 = vsel %vm1272_vm4, %v2609_v22, 0.0  ;;  %v2611_v34 = vpop.eup %2610 }
 0x64f   : > { %2612 = vpow2.f32 %v1485_v32  ;;  %1488 = vadd.xlane.f32.xlu2 %v1487_v25  ;;  %v1335_v36 = vmul.f32 %v2611_v34, %v1328_v3 }
 0x651   : > { %v1337_v40 = vpack.c.bf16 %v1335_v36, %v1335_v36 }
 0x652   : > { %v1290_v33 = vpop.xlane.xlu1 %1289 }
 0x653   : > { %2614 = vrcp.f32 %v1290_v33  ;;  %v1543_v44 = vunpack.c.l.b16 %v1337_v40 }
 0x655   : > { %v2613_v35 = vpop.eup %2612 }
 0x656   : > { %v1490_v37 = vsel %vm1272_vm4, %v2613_v35, 0.0  ;;  %v1493_v38 = vpack.c.bf16 %v2613_v35, %v2609_v22 }
 0x657   : > { %1491 = vadd.xlane.f32.xlu2 %v1490_v37 }
 0x658   : > { %2179 = vmatmul.msk.bf16.vlgmr.msrb.gmra.mxu0 %vm1272_vm4, %v1493_v38 }
 0x659   : > { %v2615_v39 = vpop.eup %2614 }
 0x65a   : > { %v1336_v41 = vmul.f32 %v2615_v39, %v1330_v4 }
 0x65c   : > { %v1338_v42 = vpack.c.bf16 %v1336_v41, %v1336_v41 }
 0x65e   : > { %v1544_v45 = vunpack.c.l.b16 %v1338_v42 }
 0x660   : > { %v1545_v46 = vpack.c.b16 %v1544_v45, %v1543_v44 }
 0x662   : > { %1693 = vmatmul.bf16.vlgmr.msrb.gmra.mxu1 %v1545_v46 }
 0x6c2   : > { %v1489_v55 = vpop.xlane.xlu2 %1488 }
 0x6c3   : > { %2616 = vrcp.f32 %v1489_v55 }
 0x6c9   : > { %v2617_v58 = vpop.eup %2616 }
 0x6ca   : > { %v1492_v56 = vpop.xlane.xlu2 %1491 }
 0x6cb   : > { %2618 = vrcp.f32 %v1492_v56 }
 0x6d1   : > { %v2619_v60 = vpop.eup %2618 }
 0x6d5   : > { %v1530_v57 = vpop.f32.mrf.mxu0 }
 0x6d6   : > { %v1537_v59 = vmul.f32 %v2617_v58, %v1530_v57 }
 0x6d8   : > { %v1539_v62 = vpack.c.bf16 %v1537_v59, %v1537_v59 }
 0x6da   : > { %v1549_v1 = vunpack.c.l.b16 %v1539_v62 }
 0x6dd   : > { %v1532_v61 = vpop.f32.mrf.mxu0 }
 0x6de   : > { %v1538_v63 = vmul.f32 %v2619_v60, %v1532_v61 }
 0x6df   : > { %v1694_v4 = vpop.f32.mrf.mxu1 }
 0x6e0   : > { %v1540_v0 = vpack.c.bf16 %v1538_v63, %v1538_v63  ;;  %v1695_v6 = vadd.f32 %v2603_v5, %v1694_v4 }
 0x6e2   : > { %v1550_v2 = vunpack.c.l.b16 %v1540_v0 }
 0x6e4   : > { %v1551_v3 = vpack.c.b16 %v1550_v2, %v1549_v1 }
 0x6e6   : > { %1707 = vmatmul.bf16.vlgmr.msrb.gmra.mxu3 %v1551_v3 }
 0x6e7   : > { %v1696_v14 = vpop.f32.mrf.mxu1 }
 0x6e8   : > { %v1697_v16 = vadd.f32 %v2603_v5, %v1696_v14 }
 0x769   : > { %v1708_v10 = vpop.f32.mrf.mxu3 }
 0x76a   : > { %v1709_v11 = vadd.f32 %v1708_v10, %v1695_v6 }
 0x76c   : > { %v1713_v13 = vadd.f32 %v2429_v20, %v1709_v11 }
 0x76e   : > { %1715 = vst [vmem:[%s3104_s8] sm:$0xff] %v1713_v13 }
 0x771   : > { %v1710_v17 = vpop.f32.mrf.mxu3 }
 0x772   : > { %v1711_v43 = vadd.f32 %v1710_v17, %v1697_v16 }
 0x774   : > { %v1714_v18 = vadd.f32 %v2430_v9, %v1711_v43 }
 0x776   : > { %1716 = vst [vmem:[%s3104_s8 + $0x8] sm:$0xff] %v1714_v18 }
 0x777   : > { %2767 = shalt.err (!%p2764_p7)
}
 0x778   : > { %s2877_s2 = smov 128   ;;  %s2878_s8 = smov 8  }
 0x779   : > { %2476 = dma.vmem_to_hbm [thread:$0]  (%p2999_p6), %s1733_s15, 256, %s1735_s21, %s1718_s30, %s2877_s2, %s2877_s2, %s2878_s8  }
 0x77a PF: > { %s3452_s23 = sld [smem:[#allocation19_spill]]  ;;  %p2503_p8 = scmp.ge.s32.totalorder %s2870_s19, 2 }
 0x77c   : > { %p2493_p9 = pnand %p2503_p8, %p3005_p10 }
 0x77e   : > { %p2494_p12 = pneg %p2493_p9 }
 0x780   : > { %s1749_s20 = sand.u32 1, %s3452_s23  }
 0x781   : > { %s1750_s12 = scalar_lea.sflag [#allocation8], %s1749_s20 }
 0x782   : > { %2825 = dma.done.wait (%p2494_p12), %s1750_s12, 256  }
 0x783   : > { %2827 = vsyncadd (%p2494_p12), %s1750_s12, 4294967040  ;;  %s27_s19 = sadd.s32 1, %s2870_s19   ;;  %s3454_s15 = sld [smem:[#allocation21_spill]] }
 0x784   : > { %p24_p13 = scmp.ge.s32.totalorder %s27_s19, 10   ;;  %s3455_s17 = sld [smem:[#allocation24_spill]] }
 0x785   : > { %s3456_s6 = sld [smem:[#allocation25_spill]]  ;;  %s3457_s30 = smov %s2834_s10 }
 0x786   : > { %s3458_s10 = smov %s2838_s11  ;;  %s3459_s11 = smov %s3072_s7 }
 0x787   : > { %s3460_s12 = smov %s2846_s13  ;;  %s3461_s13 = smov %s2850_s14 }
 0x788   : > { %s3462_s14 = smov %s3069_s5  ;;  %s3463_s16 = smov %s2866_s18 }
 0x789   :  { %26 = sbr.rel (!%p24_p13) target bundleno = 19 (0x13), region = 125 }
 0x78b   : > { %s3464_s18 = smov %s3456_s6 }
 0x78e   :  { %1756 = vsyncpa [#allocation7], 1 }
 0x78f   :  { %1758 = vsyncpa [#allocation7 + $0x1], 1 }
 0x790   :  { %1759 = vsyncpa [#allocation10], 1 }
 0x791   :  { %1760 = vsyncpa [#allocation13], 1 }
 0x792   :  { %1761 = vsyncpa [#allocation8], 1 }
 0x793   :  { %1763 = vsyncpa [#allocation8 + $0x1], 1 }

</bundles_post_ra>
